<compile_context>
chip_gen: v7x
topology: tpu7x:2x2x1
jax: 0.10.0
libtpu: 0.0.40
codegen_flags: <defaults>
</compile_context>

<pallas_src>
import functools

import jax
import jax.numpy as jnp
from jax import lax
from jax.experimental import pallas as pl
from jax.experimental.pallas import tpu as pltpu

K, S, P = 3, 2, 1        # conv kernel / stride / pad   (fixed by the module)
PK, PS, PP = 3, 2, 1     # pool kernel / stride / pad   (fixed by the module)


def _ceil_to(a, m):
    return -(-a // m) * m


def _tile_bytes(shape, dtype):
    """VMEM footprint of one block ((8,128) tile padding on the last 2 dims)."""
    shape = (1, 1) + tuple(shape)
    lead = 1
    for d in shape[:-2]:
        lead *= d
    return lead * _ceil_to(shape[-2], 8) * _ceil_to(shape[-1], 128) * \
        jnp.dtype(dtype).itemsize


def _conv_stats_kernel(xs_ref, w_ref, y_ref, stats_ref, patch_scr,
                       *, C1, C2, B, Ho, Wo):
    """One block of B images: im2col -> single MXU matmul -> BN partial stats.

    xs_ref    : (B, 4*C1, Hh, Wh)  padded input, 2x2 space-to-depth phases
    w_ref     : (C2, K*K*C1)       conv weights (compute dtype, tap-major)
    y_ref     : (C2, B*Ho*Wo)      pre-BN conv output block (lane-dense)
    stats_ref : (1, C2, 2)         per-block [sum(y), sum(y*y)] (fp32)
    patch_scr : (K*K*C1, B*Ho*Wo)  pre-flattened im2col scratch (compute dtype)
    """
    HoWo = Ho * Wo
    for b in range(B):
        for kh in range(K):
            ph, ah = kh % 2, kh // 2
            for kw in range(K):
                pw, aw = kw % 2, kw // 2
                pg = ph * 2 + pw
                t = kh * K + kw
                # 2x2 phase split makes every stride-2 tap a contiguous slice.
                tap = xs_ref[b, pg * C1:(pg + 1) * C1, ah:ah + Ho, aw:aw + Wo]
                patch_scr[t * C1:(t + 1) * C1, b * HoWo:(b + 1) * HoWo] = (
                    tap.reshape(C1, HoWo).astype(patch_scr.dtype))

    # One matmul per block, contraction = K*K*C1, fp32 accumulation on the MXU.
    y = jnp.dot(w_ref[...], patch_scr[...],
                preferred_element_type=jnp.float32)          # (C2, B*Ho*Wo)

    y_ref[...] = y.astype(y_ref.dtype)
    # Per-block partial stats (fp32, computed before the bf16 writeback cast).
    # Kept per block (not accumulated) so the grid axis stays "parallel".
    stats_ref[0, :, 0:1] = jnp.sum(y, axis=1, keepdims=True)
    stats_ref[0, :, 1:2] = jnp.sum(y * y, axis=1, keepdims=True)


def _bn_relu_maxpool_kernel(stats_ref, gamma_ref, beta_ref, y_ref, o_ref,
                            zp_scr, *, C2, B, Ho, Wo, Hmp, Wmp,
                            inv_count, eps):
    """BN(batch stats) + ReLU + 3x3/s2/p1 maxpool on one block of B images.

    stats_ref : (NBLK, C2, 2)   all per-block conv stats (tiny, constant map)
    gamma_ref : (C2, 1)         BN gamma
    beta_ref  : (C2, 1)         BN beta
    y_ref     : (C2, B*Ho*Wo)   pre-BN conv output block
    o_ref     : (C2, B*Hmp*Wmp) pooled output block (lane-dense store)
    zp_scr    : (C2, Ho+2, Wo+2) fp32 zero-halo activation scratch
    """
    # Fold raw batch stats -> per-channel scale/shift in-kernel (EUP rsqrt).
    st = jnp.sum(stats_ref[...], axis=0)                     # (C2, 2)
    mean = st[:, 0:1] * inv_count
    # NOTE: E[y^2]-E[y]^2 in fp32; clamped at 0 (fine at these scales).
    var = jnp.maximum(st[:, 1:2] * inv_count - mean * mean, 0.0)
    scale = gamma_ref[...] * lax.rsqrt(var + eps)            # (C2, 1)
    shift = beta_ref[...] - mean * scale                     # (C2, 1)

    # Zero only the 1-px halo (interior fully overwritten per image; ReLU >= 0
    # makes zero padding equivalent to -inf padding for max-pool).
    zp_scr[:, 0:1, :] = jnp.zeros((C2, 1, Wo + 2), jnp.float32)
    zp_scr[:, Ho + 1:Ho + 2, :] = jnp.zeros((C2, 1, Wo + 2), jnp.float32)
    zp_scr[:, :, 0:1] = jnp.zeros((C2, Ho + 2, 1), jnp.float32)
    zp_scr[:, :, Wo + 1:Wo + 2] = jnp.zeros((C2, Ho + 2, 1), jnp.float32)

    HoWo, HWmp = Ho * Wo, Hmp * Wmp
    for b in range(B):
        y = y_ref[:, b * HoWo:(b + 1) * HoWo].astype(jnp.float32)
        z = jnp.maximum(y * scale + shift, 0.0)              # fp32 VPU math
        zp_scr[:, 1:1 + Ho, 1:1 + Wo] = z.reshape(C2, Ho, Wo)
        zp = zp_scr[...]
        m = None
        for kh in range(PK):
            for kw in range(PK):
                tap = lax.slice(
                    zp, (0, kh, kw),
                    (C2, kh + PS * (Hmp - 1) + 1, kw + PS * (Wmp - 1) + 1),
                    (1, PS, PS))                              # (C2, Hmp, Wmp)
                m = tap if m is None else jnp.maximum(m, tap)
        o_ref[:, b * HWmp:(b + 1) * HWmp] = (
            m.reshape(C2, HWmp).astype(o_ref.dtype))


def conv_bn_relu_maxpool_forward(x, conv_w, bn_gamma, bn_beta, *,
                                 eps=1e-5, compute_dtype=jnp.bfloat16):
    """x: (N, C1, H, W), conv_w: (C2, C1, 3, 3). Returns (N, C2, Hmp, Wmp)."""
    N, C1, H, W = x.shape
    C2 = conv_w.shape[0]
    KKC1 = K * K * C1

    Ho = (H + 2 * P - K) // S + 1
    Wo = (W + 2 * P - K) // S + 1
    Hmp = (Ho + 2 * PP - PK) // PS + 1
    Wmp = (Wo + 2 * PP - PK) // PS + 1
    HoWo, HWmp = Ho * Wo, Hmp * Wmp

    cdt = jnp.dtype(compute_dtype)
    inter_dtype = cdt                 # pre-BN conv output HBM roundtrip dtype
    out_dtype = x.dtype

    # ---- one fused input-prep pass: zero-pad + 2x2 space-to-depth ----------
    Hp2 = _ceil_to(H + 2 * P, 2)
    Wp2 = _ceil_to(W + 2 * P, 2)
    xp = jnp.pad(x, ((0, 0), (0, 0), (P, Hp2 - H - P), (P, Wp2 - W - P)))
    Hh, Wh = Hp2 // 2, Wp2 // 2
    xs = xp.reshape(N, C1, Hh, 2, Wh, 2).transpose(0, 3, 5, 1, 2, 4)
    xs = xs.reshape(N, 4 * C1, Hh, Wh)
    # conv weights, tap-major im2col layout, cast once here (not per step)
    w_im2col = jnp.transpose(conv_w, (0, 2, 3, 1)).reshape(C2, KKC1).astype(cdt)
    gamma2 = bn_gamma.reshape(C2, 1).astype(jnp.float32)
    beta2 = bn_beta.reshape(C2, 1).astype(jnp.float32)

    # ---- choose images-per-grid-step B (lane-dense blocks that fit VMEM) ---
    def vmem_needs(b):
        nblk = N // b
        v1 = 2 * (_tile_bytes((b, 4 * C1, Hh, Wh), x.dtype)
                  + _tile_bytes((C2, KKC1), cdt)
                  + _tile_bytes((C2, b * HoWo), inter_dtype)
                  + _tile_bytes((1, C2, 2), jnp.float32)) \
            + _tile_bytes((KKC1, b * HoWo), cdt)
        v2 = 2 * (_tile_bytes((nblk, C2, 2), jnp.float32)
                  + 2 * _tile_bytes((C2, 1), jnp.float32)
                  + _tile_bytes((C2, b * HoWo), inter_dtype)
                  + _tile_bytes((C2, b * HWmp), out_dtype)) \
            + _tile_bytes((C2, Ho + 2, Wo + 2), jnp.float32)
        return v1, v2

    budget = 24 * 1024 * 1024     # per-kernel block budget (v7x 64MiB safe)
    divisors = [b for b in range(1, N + 1) if N % b == 0]

    def lane_aligned(b):
        # block lane dims must be 128-multiples unless they span the full axis
        return b == N or ((b * HoWo) % 128 == 0 and (b * HWmp) % 128 == 0)

    fitting = [b for b in divisors if max(vmem_needs(b)) <= budget]
    good = [b for b in fitting if lane_aligned(b)]
    if good:
        B = max(good)
    elif max(vmem_needs(N)) <= 2 * budget:
        B = N                      # single block per kernel: always layout-legal
    elif fitting:
        B = max(fitting)           # may pay lane padding; still correct
    else:
        B = 1
    NB = N // B

    v1, v2 = vmem_needs(B)
    vmem1 = int(min(48 << 20, max(32 << 20, v1 + (4 << 20))))
    vmem2 = int(min(48 << 20, max(32 << 20, v2 + (4 << 20))))

    # ---- kernel 1: conv (one im2col matmul / block) + BN partial stats -----
    y_flat, stats = pl.pallas_call(
        functools.partial(_conv_stats_kernel, C1=C1, C2=C2, B=B, Ho=Ho, Wo=Wo),
        grid=(NB,),
        in_specs=[
            pl.BlockSpec((B, 4 * C1, Hh, Wh), lambda n: (n, 0, 0, 0)),
            pl.BlockSpec((C2, KKC1), lambda n: (0, 0)),
        ],
        out_specs=(
            pl.BlockSpec((C2, B * HoWo), lambda n: (0, n)),
            pl.BlockSpec((1, C2, 2), lambda n: (n, 0, 0)),
        ),
        out_shape=(
            jax.ShapeDtypeStruct((C2, N * HoWo), inter_dtype),
            jax.ShapeDtypeStruct((NB, C2, 2), jnp.float32),
        ),
        scratch_shapes=[pltpu.VMEM((KKC1, B * HoWo), cdt)],
        compiler_params=pltpu.CompilerParams(
            dimension_semantics=("parallel",), vmem_limit_bytes=vmem1),
    )(xs, w_im2col)

    # ---- kernel 2: stats fold + BN affine + ReLU + 3x3/s2 maxpool ----------
    out_flat = pl.pallas_call(
        functools.partial(_bn_relu_maxpool_kernel, C2=C2, B=B, Ho=Ho, Wo=Wo,
                          Hmp=Hmp, Wmp=Wmp,
                          inv_count=float(1.0 / (N * Ho * Wo)),
                          eps=float(eps)),
        grid=(NB,),
        in_specs=[
            pl.BlockSpec((NB, C2, 2), lambda n: (0, 0, 0)),
            pl.BlockSpec((C2, 1), lambda n: (0, 0)),
            pl.BlockSpec((C2, 1), lambda n: (0, 0)),
            pl.BlockSpec((C2, B * HoWo), lambda n: (0, n)),
        ],
        out_specs=pl.BlockSpec((C2, B * HWmp), lambda n: (0, n)),
        out_shape=jax.ShapeDtypeStruct((C2, N * HWmp), out_dtype),
        scratch_shapes=[pltpu.VMEM((C2, Ho + 2, Wo + 2), jnp.float32)],
        compiler_params=pltpu.CompilerParams(
            dimension_semantics=("parallel",), vmem_limit_bytes=vmem2),
    )(stats, gamma2, beta2, y_flat)

    # lane-dense kernel layout (C2, N*Hmp*Wmp); final NCHW fix-up is tiny
    return out_flat.reshape(C2, N, Hmp, Wmp).transpose(1, 0, 2, 3)


def _reference(x, conv_w, bn_gamma, bn_beta, eps=1e-5):
    """Pure-JAX fp32 mirror of the PyTorch forward (for verification)."""
    N, C1, H, W = x.shape
    C2 = conv_w.shape[0]
    Ho = (H + 2 * P - K) // S + 1
    Wo = (W + 2 * P - K) // S + 1
    xp = jnp.pad(x.astype(jnp.float32), ((0, 0), (0, 0), (P, P), (P, P)))
    taps = []
    for kh in range(K):
        for kw in range(K):
            taps.append(lax.slice(
                xp, (0, 0, kh, kw),
                (N, C1, kh + S * (Ho - 1) + 1, kw + S * (Wo - 1) + 1),
                (1, 1, S, S)))
    patches = jnp.concatenate(taps, axis=1)              # (N, 9*C1, Ho, Wo)
    wmat = jnp.transpose(conv_w, (0, 2, 3, 1)).reshape(C2, K * K * C1)
    y = jnp.einsum("ok,nkhw->nohw", wmat.astype(jnp.float32), patches,
                   precision=lax.Precision.HIGHEST)
    mean = jnp.mean(y, axis=(0, 2, 3), keepdims=True)
    var = jnp.mean((y - mean) ** 2, axis=(0, 2, 3), keepdims=True)  # biased
    y = (y - mean) * lax.rsqrt(var + eps)
    y = y * bn_gamma.reshape(1, C2, 1, 1) + bn_beta.reshape(1, C2, 1, 1)
    y = jnp.maximum(y, 0.0)
    y = lax.reduce_window(y, -jnp.inf, lax.max,
                          window_dimensions=(1, 1, PK, PK),
                          window_strides=(1, 1, PS, PS),
                          padding=((0, 0), (0, 0), (PP, PP), (PP, PP)))
    return y


if __name__ == "__main__":
    # conv_bn_relu_maxpool(c1=4, c2=8), input (2, 4, 16, 16)
    N, C1, C2, H, W = 2, 4, 8, 16, 16

    key = jax.random.PRNGKey(0)
    kx, kw_, kg, kb = jax.random.split(key, 4)
    x = jax.random.normal(kx, (N, C1, H, W), dtype=jnp.float32)
    conv_w = jax.random.normal(kw_, (C2, C1, K, K), dtype=jnp.float32) * 0.2
    bn_gamma = 1.0 + 0.1 * jax.random.normal(kg, (C2,), dtype=jnp.float32)
    bn_beta = 0.1 * jax.random.normal(kb, (C2,), dtype=jnp.float32)

    out = conv_bn_relu_maxpool_forward(x, conv_w, bn_gamma, bn_beta)
    out = jax.block_until_ready(out)

    ref = _reference(x, conv_w, bn_gamma, bn_beta)
    assert out.shape == (N, C2, 4, 4), out.shape
    err = float(jnp.max(jnp.abs(out - ref)))
    # bf16 matmul operands + bf16 inter-kernel roundtrip => relaxed tolerance
    assert jnp.allclose(out, ref, atol=1e-1, rtol=5e-2), err
    print("KERNEL_OK")
</pallas_src>

<mosaic_0001>
module attributes {stable_mosaic.version = 11 : i64} {
  func.func @_conv_stats_kernel(%arg0: i32, %arg1: memref<2x16x9x9xf32, #tpu.memory_space<vmem>>, %arg2: memref<8x36xbf16, #tpu.memory_space<vmem>>, %arg3: memref<8x128xbf16, #tpu.memory_space<vmem>>, %arg4: memref<1x8x2xf32, #tpu.memory_space<vmem>>, %arg5: memref<36x128xbf16, #tpu.memory_space<vmem>>) attributes {dimension_semantics = [#tpu.dimension_semantics<parallel>], iteration_bounds = array<i64: 1>, scalar_prefetch = 0 : i64, scratch_operands = 1 : i64, tpu.core_type = #tpu.core_type<tc>, window_params = [{transform_indices = @transform_0, window_bounds = array<i64: 2, 16, 9, 9>}, {pipeline_mode = #tpu.pipeline_mode<synchronous>, transform_indices = @transform_1, window_bounds = array<i64: 8, 36>}, {transform_indices = @transform_2, window_bounds = array<i64: 8, 128>}, {transform_indices = @transform_3, window_bounds = array<i64: 1, 8, 2>}]} {
    %c0 = arith.constant 0 : index
    %c0_0 = arith.constant 0 : index
    %c0_1 = arith.constant 0 : index
    %c0_2 = arith.constant 0 : index
    %0 = vector.load %arg1[%c0, %c0_0, %c0_1, %c0_2] : memref<2x16x9x9xf32, #tpu.memory_space<vmem>>, vector<1x4x8x8xf32>
    %1 = vector.shape_cast %0 : vector<1x4x8x8xf32> to vector<4x8x8xf32>
    %2 = vector.shape_cast %1 : vector<4x8x8xf32> to vector<4x64xf32>
    %3 = arith.truncf %2 : vector<4x64xf32> to vector<4x64xbf16>
    %c0_3 = arith.constant 0 : index
    %c0_4 = arith.constant 0 : index
    %4 = vector.load %arg5[%c0_3, %c0_4] : memref<36x128xbf16, #tpu.memory_space<vmem>>, vector<4x64xbf16>
    tpu.vector_store %arg5[%c0_3, %c0_4], %3 {strides = array<i32>} : memref<36x128xbf16, #tpu.memory_space<vmem>>, vector<4x64xbf16>,
    %c0_5 = arith.constant 0 : index
    %c4 = arith.constant 4 : index
    %c0_6 = arith.constant 0 : index
    %c0_7 = arith.constant 0 : index
    %5 = vector.load %arg1[%c0_5, %c4, %c0_6, %c0_7] : memref<2x16x9x9xf32, #tpu.memory_space<vmem>>, vector<1x4x8x8xf32>
    %6 = vector.shape_cast %5 : vector<1x4x8x8xf32> to vector<4x8x8xf32>
    %7 = vector.shape_cast %6 : vector<4x8x8xf32> to vector<4x64xf32>
    %8 = arith.truncf %7 : vector<4x64xf32> to vector<4x64xbf16>
    %c4_8 = arith.constant 4 : index
    %c0_9 = arith.constant 0 : index
    %9 = vector.load %arg5[%c4_8, %c0_9] : memref<36x128xbf16, #tpu.memory_space<vmem>>, vector<4x64xbf16>
    tpu.vector_store %arg5[%c4_8, %c0_9], %8 {strides = array<i32>} : memref<36x128xbf16, #tpu.memory_space<vmem>>, vector<4x64xbf16>,
    %c0_10 = arith.constant 0 : index
    %c0_11 = arith.constant 0 : index
    %c0_12 = arith.constant 0 : index
    %c1 = arith.constant 1 : index
    %10 = vector.load %arg1[%c0_10, %c0_11, %c0_12, %c1] : memref<2x16x9x9xf32, #tpu.memory_space<vmem>>, vector<1x4x8x8xf32>
    %11 = vector.shape_cast %10 : vector<1x4x8x8xf32> to vector<4x8x8xf32>
    %12 = vector.shape_cast %11 : vector<4x8x8xf32> to vector<4x64xf32>
    %13 = arith.truncf %12 : vector<4x64xf32> to vector<4x64xbf16>
    %c8 = arith.constant 8 : index
    %c0_13 = arith.constant 0 : index
    %14 = vector.load %arg5[%c8, %c0_13] : memref<36x128xbf16, #tpu.memory_space<vmem>>, vector<4x64xbf16>
    tpu.vector_store %arg5[%c8, %c0_13], %13 {strides = array<i32>} : memref<36x128xbf16, #tpu.memory_space<vmem>>, vector<4x64xbf16>,
    %c0_14 = arith.constant 0 : index
    %c8_15 = arith.constant 8 : index
    %c0_16 = arith.constant 0 : index
    %c0_17 = arith.constant 0 : index
    %15 = vector.load %arg1[%c0_14, %c8_15, %c0_16, %c0_17] : memref<2x16x9x9xf32, #tpu.memory_space<vmem>>, vector<1x4x8x8xf32>
    %16 = vector.shape_cast %15 : vector<1x4x8x8xf32> to vector<4x8x8xf32>
    %17 = vector.shape_cast %16 : vector<4x8x8xf32> to vector<4x64xf32>
    %18 = arith.truncf %17 : vector<4x64xf32> to vector<4x64xbf16>
    %c12 = arith.constant 12 : index
    %c0_18 = arith.constant 0 : index
    %19 = vector.load %arg5[%c12, %c0_18] : memref<36x128xbf16, #tpu.memory_space<vmem>>, vector<4x64xbf16>
    tpu.vector_store %arg5[%c12, %c0_18], %18 {strides = array<i32>} : memref<36x128xbf16, #tpu.memory_space<vmem>>, vector<4x64xbf16>,
    %c0_19 = arith.constant 0 : index
    %c12_20 = arith.constant 12 : index
    %c0_21 = arith.constant 0 : index
    %c0_22 = arith.constant 0 : index
    %20 = vector.load %arg1[%c0_19, %c12_20, %c0_21, %c0_22] : memref<2x16x9x9xf32, #tpu.memory_space<vmem>>, vector<1x4x8x8xf32>
    %21 = vector.shape_cast %20 : vector<1x4x8x8xf32> to vector<4x8x8xf32>
    %22 = vector.shape_cast %21 : vector<4x8x8xf32> to vector<4x64xf32>
    %23 = arith.truncf %22 : vector<4x64xf32> to vector<4x64xbf16>
    %c16 = arith.constant 16 : index
    %c0_23 = arith.constant 0 : index
    %24 = vector.load %arg5[%c16, %c0_23] : memref<36x128xbf16, #tpu.memory_space<vmem>>, vector<4x64xbf16>
    tpu.vector_store %arg5[%c16, %c0_23], %23 {strides = array<i32>} : memref<36x128xbf16, #tpu.memory_space<vmem>>, vector<4x64xbf16>,
    %c0_24 = arith.constant 0 : index
    %c8_25 = arith.constant 8 : index
    %c0_26 = arith.constant 0 : index
    %c1_27 = arith.constant 1 : index
    %25 = vector.load %arg1[%c0_24, %c8_25, %c0_26, %c1_27] : memref<2x16x9x9xf32, #tpu.memory_space<vmem>>, vector<1x4x8x8xf32>
    %26 = vector.shape_cast %25 : vector<1x4x8x8xf32> to vector<4x8x8xf32>
    %27 = vector.shape_cast %26 : vector<4x8x8xf32> to vector<4x64xf32>
    %28 = arith.truncf %27 : vector<4x64xf32> to vector<4x64xbf16>
    %c20 = arith.constant 20 : index
    %c0_28 = arith.constant 0 : index
    %29 = vector.load %arg5[%c20, %c0_28] : memref<36x128xbf16, #tpu.memory_space<vmem>>, vector<4x64xbf16>
    tpu.vector_store %arg5[%c20, %c0_28], %28 {strides = array<i32>} : memref<36x128xbf16, #tpu.memory_space<vmem>>, vector<4x64xbf16>,
    %c0_29 = arith.constant 0 : index
    %c0_30 = arith.constant 0 : index
    %c1_31 = arith.constant 1 : index
    %c0_32 = arith.constant 0 : index
    %30 = vector.load %arg1[%c0_29, %c0_30, %c1_31, %c0_32] : memref<2x16x9x9xf32, #tpu.memory_space<vmem>>, vector<1x4x8x8xf32>
    %31 = vector.shape_cast %30 : vector<1x4x8x8xf32> to vector<4x8x8xf32>
    %32 = vector.shape_cast %31 : vector<4x8x8xf32> to vector<4x64xf32>
    %33 = arith.truncf %32 : vector<4x64xf32> to vector<4x64xbf16>
    %c24 = arith.constant 24 : index
    %c0_33 = arith.constant 0 : index
    %34 = vector.load %arg5[%c24, %c0_33] : memref<36x128xbf16, #tpu.memory_space<vmem>>, vector<4x64xbf16>
    tpu.vector_store %arg5[%c24, %c0_33], %33 {strides = array<i32>} : memref<36x128xbf16, #tpu.memory_space<vmem>>, vector<4x64xbf16>,
    %c0_34 = arith.constant 0 : index
    %c4_35 = arith.constant 4 : index
    %c1_36 = arith.constant 1 : index
    %c0_37 = arith.constant 0 : index
    %35 = vector.load %arg1[%c0_34, %c4_35, %c1_36, %c0_37] : memref<2x16x9x9xf32, #tpu.memory_space<vmem>>, vector<1x4x8x8xf32>
    %36 = vector.shape_cast %35 : vector<1x4x8x8xf32> to vector<4x8x8xf32>
    %37 = vector.shape_cast %36 : vector<4x8x8xf32> to vector<4x64xf32>
    %38 = arith.truncf %37 : vector<4x64xf32> to vector<4x64xbf16>
    %c28 = arith.constant 28 : index
    %c0_38 = arith.constant 0 : index
    %39 = vector.load %arg5[%c28, %c0_38] : memref<36x128xbf16, #tpu.memory_space<vmem>>, vector<4x64xbf16>
    tpu.vector_store %arg5[%c28, %c0_38], %38 {strides = array<i32>} : memref<36x128xbf16, #tpu.memory_space<vmem>>, vector<4x64xbf16>,
    %c0_39 = arith.constant 0 : index
    %c0_40 = arith.constant 0 : index
    %c1_41 = arith.constant 1 : index
    %c1_42 = arith.constant 1 : index
    %40 = vector.load %arg1[%c0_39, %c0_40, %c1_41, %c1_42] : memref<2x16x9x9xf32, #tpu.memory_space<vmem>>, vector<1x4x8x8xf32>
    %41 = vector.shape_cast %40 : vector<1x4x8x8xf32> to vector<4x8x8xf32>
    %42 = vector.shape_cast %41 : vector<4x8x8xf32> to vector<4x64xf32>
    %43 = arith.truncf %42 : vector<4x64xf32> to vector<4x64xbf16>
    %c32 = arith.constant 32 : index
    %c0_43 = arith.constant 0 : index
    %44 = vector.load %arg5[%c32, %c0_43] : memref<36x128xbf16, #tpu.memory_space<vmem>>, vector<4x64xbf16>
    tpu.vector_store %arg5[%c32, %c0_43], %43 {strides = array<i32>} : memref<36x128xbf16, #tpu.memory_space<vmem>>, vector<4x64xbf16>,
    %c1_44 = arith.constant 1 : index
    %c0_45 = arith.constant 0 : index
    %c0_46 = arith.constant 0 : index
    %c0_47 = arith.constant 0 : index
    %45 = vector.load %arg1[%c1_44, %c0_45, %c0_46, %c0_47] : memref<2x16x9x9xf32, #tpu.memory_space<vmem>>, vector<1x4x8x8xf32>
    %46 = vector.shape_cast %45 : vector<1x4x8x8xf32> to vector<4x8x8xf32>
    %47 = vector.shape_cast %46 : vector<4x8x8xf32> to vector<4x64xf32>
    %48 = arith.truncf %47 : vector<4x64xf32> to vector<4x64xbf16>
    %c0_48 = arith.constant 0 : index
    %c64 = arith.constant 64 : index
    %49 = vector.load %arg5[%c0_48, %c64] : memref<36x128xbf16, #tpu.memory_space<vmem>>, vector<4x64xbf16>
    tpu.vector_store %arg5[%c0_48, %c64], %48 {strides = array<i32>} : memref<36x128xbf16, #tpu.memory_space<vmem>>, vector<4x64xbf16>,
    %c1_49 = arith.constant 1 : index
    %c4_50 = arith.constant 4 : index
    %c0_51 = arith.constant 0 : index
    %c0_52 = arith.constant 0 : index
    %50 = vector.load %arg1[%c1_49, %c4_50, %c0_51, %c0_52] : memref<2x16x9x9xf32, #tpu.memory_space<vmem>>, vector<1x4x8x8xf32>
    %51 = vector.shape_cast %50 : vector<1x4x8x8xf32> to vector<4x8x8xf32>
    %52 = vector.shape_cast %51 : vector<4x8x8xf32> to vector<4x64xf32>
    %53 = arith.truncf %52 : vector<4x64xf32> to vector<4x64xbf16>
    %c4_53 = arith.constant 4 : index
    %c64_54 = arith.constant 64 : index
    %54 = vector.load %arg5[%c4_53, %c64_54] : memref<36x128xbf16, #tpu.memory_space<vmem>>, vector<4x64xbf16>
    tpu.vector_store %arg5[%c4_53, %c64_54], %53 {strides = array<i32>} : memref<36x128xbf16, #tpu.memory_space<vmem>>, vector<4x64xbf16>,
    %c1_55 = arith.constant 1 : index
    %c0_56 = arith.constant 0 : index
    %c0_57 = arith.constant 0 : index
    %c1_58 = arith.constant 1 : index
    %55 = vector.load %arg1[%c1_55, %c0_56, %c0_57, %c1_58] : memref<2x16x9x9xf32, #tpu.memory_space<vmem>>, vector<1x4x8x8xf32>
    %56 = vector.shape_cast %55 : vector<1x4x8x8xf32> to vector<4x8x8xf32>
    %57 = vector.shape_cast %56 : vector<4x8x8xf32> to vector<4x64xf32>
    %58 = arith.truncf %57 : vector<4x64xf32> to vector<4x64xbf16>
    %c8_59 = arith.constant 8 : index
    %c64_60 = arith.constant 64 : index
    %59 = vector.load %arg5[%c8_59, %c64_60] : memref<36x128xbf16, #tpu.memory_space<vmem>>, vector<4x64xbf16>
    tpu.vector_store %arg5[%c8_59, %c64_60], %58 {strides = array<i32>} : memref<36x128xbf16, #tpu.memory_space<vmem>>, vector<4x64xbf16>,
    %c1_61 = arith.constant 1 : index
    %c8_62 = arith.constant 8 : index
    %c0_63 = arith.constant 0 : index
    %c0_64 = arith.constant 0 : index
    %60 = vector.load %arg1[%c1_61, %c8_62, %c0_63, %c0_64] : memref<2x16x9x9xf32, #tpu.memory_space<vmem>>, vector<1x4x8x8xf32>
    %61 = vector.shape_cast %60 : vector<1x4x8x8xf32> to vector<4x8x8xf32>
    %62 = vector.shape_cast %61 : vector<4x8x8xf32> to vector<4x64xf32>
    %63 = arith.truncf %62 : vector<4x64xf32> to vector<4x64xbf16>
    %c12_65 = arith.constant 12 : index
    %c64_66 = arith.constant 64 : index
    %64 = vector.load %arg5[%c12_65, %c64_66] : memref<36x128xbf16, #tpu.memory_space<vmem>>, vector<4x64xbf16>
    tpu.vector_store %arg5[%c12_65, %c64_66], %63 {strides = array<i32>} : memref<36x128xbf16, #tpu.memory_space<vmem>>, vector<4x64xbf16>,
    %c1_67 = arith.constant 1 : index
    %c12_68 = arith.constant 12 : index
    %c0_69 = arith.constant 0 : index
    %c0_70 = arith.constant 0 : index
    %65 = vector.load %arg1[%c1_67, %c12_68, %c0_69, %c0_70] : memref<2x16x9x9xf32, #tpu.memory_space<vmem>>, vector<1x4x8x8xf32>
    %66 = vector.shape_cast %65 : vector<1x4x8x8xf32> to vector<4x8x8xf32>
    %67 = vector.shape_cast %66 : vector<4x8x8xf32> to vector<4x64xf32>
    %68 = arith.truncf %67 : vector<4x64xf32> to vector<4x64xbf16>
    %c16_71 = arith.constant 16 : index
    %c64_72 = arith.constant 64 : index
    %69 = vector.load %arg5[%c16_71, %c64_72] : memref<36x128xbf16, #tpu.memory_space<vmem>>, vector<4x64xbf16>
    tpu.vector_store %arg5[%c16_71, %c64_72], %68 {strides = array<i32>} : memref<36x128xbf16, #tpu.memory_space<vmem>>, vector<4x64xbf16>,
    %c1_73 = arith.constant 1 : index
    %c8_74 = arith.constant 8 : index
    %c0_75 = arith.constant 0 : index
    %c1_76 = arith.constant 1 : index
    %70 = vector.load %arg1[%c1_73, %c8_74, %c0_75, %c1_76] : memref<2x16x9x9xf32, #tpu.memory_space<vmem>>, vector<1x4x8x8xf32>
    %71 = vector.shape_cast %70 : vector<1x4x8x8xf32> to vector<4x8x8xf32>
    %72 = vector.shape_cast %71 : vector<4x8x8xf32> to vector<4x64xf32>
    %73 = arith.truncf %72 : vector<4x64xf32> to vector<4x64xbf16>
    %c20_77 = arith.constant 20 : index
    %c64_78 = arith.constant 64 : index
    %74 = vector.load %arg5[%c20_77, %c64_78] : memref<36x128xbf16, #tpu.memory_space<vmem>>, vector<4x64xbf16>
    tpu.vector_store %arg5[%c20_77, %c64_78], %73 {strides = array<i32>} : memref<36x128xbf16, #tpu.memory_space<vmem>>, vector<4x64xbf16>,
    %c1_79 = arith.constant 1 : index
    %c0_80 = arith.constant 0 : index
    %c1_81 = arith.constant 1 : index
    %c0_82 = arith.constant 0 : index
    %75 = vector.load %arg1[%c1_79, %c0_80, %c1_81, %c0_82] : memref<2x16x9x9xf32, #tpu.memory_space<vmem>>, vector<1x4x8x8xf32>
    %76 = vector.shape_cast %75 : vector<1x4x8x8xf32> to vector<4x8x8xf32>
    %77 = vector.shape_cast %76 : vector<4x8x8xf32> to vector<4x64xf32>
    %78 = arith.truncf %77 : vector<4x64xf32> to vector<4x64xbf16>
    %c24_83 = arith.constant 24 : index
    %c64_84 = arith.constant 64 : index
    %79 = vector.load %arg5[%c24_83, %c64_84] : memref<36x128xbf16, #tpu.memory_space<vmem>>, vector<4x64xbf16>
    tpu.vector_store %arg5[%c24_83, %c64_84], %78 {strides = array<i32>} : memref<36x128xbf16, #tpu.memory_space<vmem>>, vector<4x64xbf16>,
    %c1_85 = arith.constant 1 : index
    %c4_86 = arith.constant 4 : index
    %c1_87 = arith.constant 1 : index
    %c0_88 = arith.constant 0 : index
    %80 = vector.load %arg1[%c1_85, %c4_86, %c1_87, %c0_88] : memref<2x16x9x9xf32, #tpu.memory_space<vmem>>, vector<1x4x8x8xf32>
    %81 = vector.shape_cast %80 : vector<1x4x8x8xf32> to vector<4x8x8xf32>
    %82 = vector.shape_cast %81 : vector<4x8x8xf32> to vector<4x64xf32>
    %83 = arith.truncf %82 : vector<4x64xf32> to vector<4x64xbf16>
    %c28_89 = arith.constant 28 : index
    %c64_90 = arith.constant 64 : index
    %84 = vector.load %arg5[%c28_89, %c64_90] : memref<36x128xbf16, #tpu.memory_space<vmem>>, vector<4x64xbf16>
    tpu.vector_store %arg5[%c28_89, %c64_90], %83 {strides = array<i32>} : memref<36x128xbf16, #tpu.memory_space<vmem>>, vector<4x64xbf16>,
    %c1_91 = arith.constant 1 : index
    %c0_92 = arith.constant 0 : index
    %c1_93 = arith.constant 1 : index
    %c1_94 = arith.constant 1 : index
    %85 = vector.load %arg1[%c1_91, %c0_92, %c1_93, %c1_94] : memref<2x16x9x9xf32, #tpu.memory_space<vmem>>, vector<1x4x8x8xf32>
    %86 = vector.shape_cast %85 : vector<1x4x8x8xf32> to vector<4x8x8xf32>
    %87 = vector.shape_cast %86 : vector<4x8x8xf32> to vector<4x64xf32>
    %88 = arith.truncf %87 : vector<4x64xf32> to vector<4x64xbf16>
    %c32_95 = arith.constant 32 : index
    %c64_96 = arith.constant 64 : index
    %89 = vector.load %arg5[%c32_95, %c64_96] : memref<36x128xbf16, #tpu.memory_space<vmem>>, vector<4x64xbf16>
    tpu.vector_store %arg5[%c32_95, %c64_96], %88 {strides = array<i32>} : memref<36x128xbf16, #tpu.memory_space<vmem>>, vector<4x64xbf16>,
    %c0_97 = arith.constant 0 : index
    %c0_98 = arith.constant 0 : index
    %90 = vector.load %arg2[%c0_97, %c0_98] : memref<8x36xbf16, #tpu.memory_space<vmem>>, vector<8x36xbf16>
    %c0_99 = arith.constant 0 : index
    %c0_100 = arith.constant 0 : index
    %91 = vector.load %arg5[%c0_99, %c0_100] : memref<36x128xbf16, #tpu.memory_space<vmem>>, vector<36x128xbf16>
    %cst = arith.constant dense<0.000000e+00> : vector<8x128xf32>
    %92 = tpu.matmul %90, %91, %cst {dimension_numbers = #tpu.dot_dimension_numbers<[1], [0], [0], [1], [0, 0, 1, 1], [], []>} : vector<8x36xbf16>, vector<36x128xbf16>, vector<8x128xf32> -> vector<8x128xf32>
    %93 = arith.truncf %92 : vector<8x128xf32> to vector<8x128xbf16>
    %c0_101 = arith.constant 0 : index
    %c0_102 = arith.constant 0 : index
    %94 = vector.load %arg3[%c0_101, %c0_102] : memref<8x128xbf16, #tpu.memory_space<vmem>>, vector<8x128xbf16>
    tpu.vector_store %arg3[%c0_101, %c0_102], %93 {strides = array<i32>} : memref<8x128xbf16, #tpu.memory_space<vmem>>, vector<8x128xbf16>,
    %cst_103 = arith.constant dense<0.000000e+00> : vector<8xf32>
    %95 = vector.multi_reduction <add>, %92, %cst_103 [1] : vector<8x128xf32> to vector<8xf32>
    %96 = vector.shape_cast %95 : vector<8xf32> to vector<8x1xf32>
    %c0_104 = arith.constant 0 : index
    %c0_105 = arith.constant 0 : index
    %c0_106 = arith.constant 0 : index
    %97 = vector.load %arg4[%c0_104, %c0_105, %c0_106] : memref<1x8x2xf32, #tpu.memory_space<vmem>>, vector<1x8x1xf32>
    %98 = vector.shape_cast %97 : vector<1x8x1xf32> to vector<8x1xf32>
    %99 = vector.shape_cast %96 : vector<8x1xf32> to vector<1x8x1xf32>
    tpu.vector_store %arg4[%c0_104, %c0_105, %c0_106], %99 {strides = array<i32>} : memref<1x8x2xf32, #tpu.memory_space<vmem>>, vector<1x8x1xf32>,
    %100 = arith.mulf %92, %92 : vector<8x128xf32>
    %cst_107 = arith.constant dense<0.000000e+00> : vector<8xf32>
    %101 = vector.multi_reduction <add>, %100, %cst_107 [1] : vector<8x128xf32> to vector<8xf32>
    %102 = vector.shape_cast %101 : vector<8xf32> to vector<8x1xf32>
    %c0_108 = arith.constant 0 : index
    %c0_109 = arith.constant 0 : index
    %c1_110 = arith.constant 1 : index
    %103 = vector.load %arg4[%c0_108, %c0_109, %c1_110] : memref<1x8x2xf32, #tpu.memory_space<vmem>>, vector<1x8x1xf32>
    %104 = vector.shape_cast %103 : vector<1x8x1xf32> to vector<8x1xf32>
    %105 = vector.shape_cast %102 : vector<8x1xf32> to vector<1x8x1xf32>
    tpu.vector_store %arg4[%c0_108, %c0_109, %c1_110], %105 {strides = array<i32>} : memref<1x8x2xf32, #tpu.memory_space<vmem>>, vector<1x8x1xf32>,
    return
  }
  func.func @transform_0(%arg0: i32) -> (i32, i32, i32, i32) {
    %c0_i32 = arith.constant 0 : i32
    %c0_i32_0 = arith.constant 0 : i32
    %c0_i32_1 = arith.constant 0 : i32
    %c0_i32_2 = arith.constant 0 : i32
    return %arg0, %c0_i32, %c0_i32_0, %c0_i32_1 : i32, i32, i32, i32
  }
  func.func @transform_1(%arg0: i32) -> (i32, i32) {
    %c0_i32 = arith.constant 0 : i32
    %c0_i32_0 = arith.constant 0 : i32
    %c0_i32_1 = arith.constant 0 : i32
    return %c0_i32, %c0_i32_0 : i32, i32
  }
  func.func @transform_2(%arg0: i32) -> (i32, i32) {
    %c0_i32 = arith.constant 0 : i32
    %c0_i32_0 = arith.constant 0 : i32
    return %c0_i32, %arg0 : i32, i32
  }
  func.func @transform_3(%arg0: i32) -> (i32, i32, i32) {
    %c0_i32 = arith.constant 0 : i32
    %c0_i32_0 = arith.constant 0 : i32
    %c0_i32_1 = arith.constant 0 : i32
    return %arg0, %c0_i32, %c0_i32_0 : i32, i32, i32
  }
}

</mosaic_0001>

<bundles_post_ra>
// kernel: tpu_custom_call.1
= control target key start
LH: loop header
LB: loop body
LE: loop exit
PB: predicated region body
PF: predicated region fallthrough
CT: control target
= control target key end

     0   :  { %s2723_s16 = smov 127   ;;  %v2724_v7 = vmov 0.0   ;;  %s4120_s0 = inlined_call_operand.vmem [shape: f32[2,16,9,9], index: 0, kind: input, shape index: {}]   ;;  %s4121_s1 = inlined_call_operand.vmem [shape: bf16[8,36], index: 1, kind: input, shape index: {}]   ;;  %s4122_s2 = inlined_call_operand.hbm [shape: bf16[8,128], index: 2, kind: output, shape index: {0}]   ;;  %s4123_s3 = inlined_call_operand.vmem [shape: f32[1,8,2], index: 3, kind: output, shape index: {1}]  }
   0x1   :  { %v2760_v0 = vld [vmem:[%s4120_s0 + $0x120] sm:$0xff]  ;;  %v2774_v2 = vld [vmem:[%s4120_s0 + $0x130] sm:$0xff]  ;;  %2357 = vmatprep.subr.bf16.mxu0 %v2724_v7 }
   0x2   :  { %v2765_v1 = vld [vmem:[%s4120_s0 + $0x100] sm:$0xff]  ;;  %1323 = vrot.lane.b32.xlu1 %v2760_v0, %s2723_s16  ;;  %v2779_v3 = vld [vmem:[%s4120_s0 + $0x110] sm:$0xff] }
   0x3   :  { %1319 = vrot.lane.b32.xlu0 %v2765_v1, %s2723_s16  ;;  %v1081_v4 = vcombine.low %v2765_v1, %v2760_v0  ;;  %v1097_v5 = vcombine.low %v2779_v3, %v2774_v2  ;;  %v1082_v6 = vcombine.high %v2765_v1, %v2760_v0  ;;  %v2795_v8 = vld [vmem:[%s4120_s0 + $0x190] sm:$0xff]  ;;  %v2316_v9 = vld [vmem:[%s4120_s0 + $0x180] sm:$0xff]  ;;  %v1098_v10 = vcombine.high %v2779_v3, %v2774_v2 }
   0x4   :  { %v2319_v11 = vld [vmem:[%s4120_s0 + $0x1b0] sm:$0xff]  ;;  %v2318_v12 = vld [vmem:[%s4120_s0 + $0x1a0] sm:$0xff] }
   0x5   :  { %v2816_v13 = vld [vmem:[%s4120_s0 + $0x111] sm:$0xff]  ;;  %v2821_v14 = vld [vmem:[%s4120_s0 + $0x101] sm:$0xff] }
   0x6   :  { %1325 = vrot.lane.b32.xlu1 %v2774_v2, %s2723_s16 }
   0x7   :  { %1321 = vrot.lane.b32.xlu0 %v2779_v3, %s2723_s16 }
   0xa   :  { %1685 = vrot.lane.b32.xlu1 %v2795_v8, %s2723_s16 }
   0xb   :  { %1683 = vrot.lane.b32.xlu0 %v2316_v9, %s2723_s16 }
   0xe   :  { %1689 = vrot.lane.b32.xlu1 %v2319_v11, %s2723_s16 }
   0xf   :  { %1687 = vrot.lane.b32.xlu0 %v2318_v12, %s2723_s16 }
  0x10   :  { %9 = vsyncpa [#allocation4], 0  ;;  %v2725_v15 = vmov 1983009808   ;;  %v24_v17 = vlaneseq  ;;  %v2830_v18 = vld [vmem:[%s4120_s0 + $0x131] sm:$0xff]  ;;  %v2835_v19 = vld [vmem:[%s4120_s0 + $0x121] sm:$0xff]  ;;  %v1447_v31 = vcombine.low %v2316_v9, %v2318_v12  ;;  %v1463_v32 = vcombine.low %v2795_v8, %v2319_v11 }
  0x11   :  { %v22_v16 = vunpack.c.l.s4 %v2725_v15  ;;  %v2840_v20 = vld [vmem:[%s4120_s0 + $0x10] sm:$0xff]  ;;  %v2849_v23 = vld [vmem:[%s4120_s0] sm:$0xff]  ;;  %v2726_v28 = vmov 1934713408   ;;  %v1448_v38 = vcombine.high %v2316_v9, %v2318_v12  ;;  %v1464_v41 = vcombine.high %v2795_v8, %v2319_v11  ;;  %s2728_s25 = smov 8   ;;  %s2729_s26 = smov 24  }
  0x12   :  { %2048 = vrot.lane.b32.xlu1 %v2816_v13, %s2723_s16  ;;  %v25_v22 = vshrl.u32 %v24_v17, 7  ;;  %v2296_v24 = vld [vmem:[%s4120_s0 + $0x140] sm:$0xff]  ;;  %v2297_v25 = vld [vmem:[%s4120_s0 + $0x150] sm:$0xff]  ;;  %v54_v29 = vunpack.c.l.s4 %v2726_v28  ;;  %v1827_v44 = vcombine.low %v2816_v13, %v2830_v18  ;;  %v1811_v49 = vcombine.low %v2821_v14, %v2835_v19  ;;  %s2730_s27 = smov 48   ;;  %s2731_s28 = smov 32  }
  0x13   :  { %2046 = vrot.lane.b32.xlu0 %v2821_v14, %s2723_s16  ;;  %v23_v21 = vunpack.c.0.s8 %v22_v16  ;;  %v2298_v26 = vld [vmem:[%s4120_s0 + $0x160] sm:$0xff]  ;;  %v2299_v27 = vld [vmem:[%s4120_s0 + $0x170] sm:$0xff]  ;;  %v1828_v28 = vcombine.high %v2816_v13, %v2830_v18  ;;  %s2732_s29 = smov 40   ;;  %s2733_s30 = smov 56   ;;  %vm115_vm0 = vcmask 64512   ;;  %vm117_vm1 = vcmask 130048  }
  0x14   :  { %v1198_v33 = vcombine.low %v2296_v24, %v2298_v26  ;;  %v1214_v34 = vcombine.low %v2297_v25, %v2299_v27  ;;  %v2873_v35 = vld [vmem:[%s4120_s0 + $0x30] sm:$0xff]  ;;  %v2878_v36 = vld [vmem:[%s4120_s0 + $0x20] sm:$0xff]  ;;  %v55_v37 = vunpack.c.0.s8 %v54_v29  ;;  %v1199_v52 = vcombine.high %v2296_v24, %v2298_v26 }
  0x15   :  { %v2863_v30 = vsub.s32 %v23_v21, %v25_v22  ;;  %v2886_v42 = vld [vmem:[%s4120_s0 + $0x1c0] sm:$0xff]  ;;  %v2891_v43 = vld [vmem:[%s4120_s0 + $0x1d0] sm:$0xff]  ;;  %v1215_v53 = vcombine.high %v2297_v25, %v2299_v27  ;;  %vm119_vm2 = vcmask 195584   ;;  %vm121_vm3 = vcmask 261120  }
  0x16   :  { %2052 = vrot.lane.b32.xlu1 %v2830_v18, %s2723_s16  ;;  %v2904_v47 = vld [vmem:[%s4120_s0 + $0x1e0] sm:$0xff]  ;;  %v2909_v48 = vld [vmem:[%s4120_s0 + $0x1f0] sm:$0xff]  ;;  %v2935_v56 = vsub.s32 %v55_v37, %v25_v22  ;;  %vm123_vm4 = vcmask 326656   ;;  %vm125_vm5 = vcmask 392192   ;;  %vm127_vm6 = vcmask 457728  }
  0x17   :  { %2050 = vrot.lane.b32.xlu0 %v2835_v19, %s2723_s16  ;;  %v1455_v39 = vrot.slane %v1447_v31, %v2863_v30  ;;  %v1471_v40 = vrot.slane %v1463_v32, %v2863_v30  ;;  %v1206_v45 = vrot.slane %v1198_v33, %v2863_v30  ;;  %v1222_v46 = vrot.slane %v1214_v34, %v2863_v30  ;;  %v2916_v50 = vld [vmem:[%s4120_s0 + $0x90] sm:$0xff]  ;;  %v2921_v51 = vld [vmem:[%s4120_s0 + $0x80] sm:$0xff] }
  0x18   :  { %v2927_v54 = vrot.slane %v1081_v4, %v2863_v30  ;;  %v2933_v55 = vrot.slane %v1097_v5, %v2863_v30  ;;  %v1462_v57 = vrot.slane %v1448_v38, %v2863_v30  ;;  %v1478_v59 = vrot.slane %v1464_v41, %v2863_v30  ;;  %v2957_v5 = vld [vmem:[%s4120_s0 + $0xb0] sm:$0xff]  ;;  %v2962_v8 = vld [vmem:[%s4120_s0 + $0xa0] sm:$0xff] }
  0x19   :  { %v1479_v58 = vcombine.low %v1455_v39, %v1471_v40  ;;  %v1564_v60 = vcombine.low %v2886_v42, %v2904_v47  ;;  %v1580_v61 = vcombine.low %v2891_v43, %v2909_v48  ;;  %v1230_v62 = vcombine.low %v1206_v45, %v1222_v46  ;;  %v3023_v38 = vld [vmem:[%s4120_s0 + $0x31] sm:$0xff] }
  0x1a   :  { %258 = vrot.lane.b32.xlu1 %v2840_v20, %s2723_s16  ;;  %v1819_v63 = vrot.slane %v1811_v49, %v2863_v30  ;;  %v2952_v4 = vrot.slane %v1082_v6, %v2863_v30  ;;  %v1213_v9 = vrot.slane %v1199_v52, %v2863_v30  ;;  %v1229_v11 = vrot.slane %v1215_v53, %v2863_v30 }
  0x1b   :  { %256 = vrot.lane.b32.xlu0 %v2849_v23, %s2723_s16  ;;  %v1835_v12 = vrot.slane %v1827_v44, %v2863_v30  ;;  %v1114_v0 = vcombine.high %v2927_v54, %v2933_v55  ;;  %v1480_v1 = vcombine.high %v1455_v39, %v1471_v40  ;;  %v1812_v6 = vcombine.high %v2821_v14, %v2835_v19  ;;  %v3001_v19 = vld [vmem:[%s4120_s0 + $0x1] sm:$0xff] }
  0x1c   :  { %v2975_v15 = vrot.slane %v1098_v10, %v2863_v30  ;;  %v1231_v16 = vcombine.high %v1206_v45, %v1222_v46  ;;  %v2978_v17 = vrot.slane %v1479_v58, %v2935_v56  ;;  %v1572_v21 = vrot.slane %v1564_v60, %v2863_v30  ;;  %v2996_v10 = vld [vmem:[%s4120_s0 + $0x11] sm:$0xff]  ;;  %v3028_v39 = vld [vmem:[%s4120_s0 + $0x21] sm:$0xff] }
  0x1d   :  { %v1588_v22 = vrot.slane %v1580_v61, %v2863_v30  ;;  %v2987_v14 = vrot.slane %v1230_v62, %v2935_v56  ;;  %v1247_v24 = vcombine.high %v1213_v9, %v1229_v11  ;;  %v1496_v25 = vcombine.high %v1462_v57, %v1478_v59 }
  0x1e   :  { %262 = vrot.lane.b32.xlu1 %v2873_v35, %s2723_s16  ;;  %4141 = vst [vmem:[#allocation6_spill] sm:$0xff] %v2978_v17  ;;  %v1129_v2 = vcombine.low %v2952_v4, %v2975_v15  ;;  %v1130_v3 = vcombine.high %v2952_v4, %v2975_v15  ;;  %v1843_v26 = vcombine.low %v1819_v63, %v1835_v12  ;;  %vm246_vm7 = vcmask 519170  }
  0x1f   :  { %260 = vrot.lane.b32.xlu0 %v2878_v36, %s2723_s16  ;;  %4142 = vst [vmem:[#allocation7_spill] sm:$0xff] %v2987_v14  ;;  %v1495_v27 = vcombine.low %v1462_v57, %v1478_v59  ;;  %v1113_v29 = vcombine.low %v2927_v54, %v2933_v55  ;;  %v1494_v31 = vrot.slane %v1480_v1, %v2935_v56  ;;  %vm2735_vm8 = vmmov 0  }
  0x20   :  { %v1511_v32 = vcombine.high %v2978_v17, %v2724_v7  ;;  %v1596_v33 = vcombine.low %v1572_v21, %v1588_v22  ;;  %v3011_v34 = vrot.slane %v1812_v6, %v2863_v30  ;;  %v1245_v13 = vrot.slane %v1231_v16, %v2935_v56  ;;  %2363 = vmatprep.mubr.msk.bf16.mxu0 %vm2735_vm8, %v2724_v7 }
  0x21   :  { %v1262_v18 = vcombine.high %v2987_v14, %v2724_v7  ;;  %v1246_v37 = vcombine.low %v1213_v9, %v1229_v11  ;;  %v1261_v40 = vrot.slane %v1247_v24, %v2935_v56  ;;  %v1510_v41 = vrot.slane %v1496_v25, %v2935_v56 }
  0x22   :  { %608 = vrot.lane.b32.xlu1 %v2916_v50, %s2723_s16  ;;  %v3033_v44 = vrot.slane %v1843_v26, %v2935_v56  ;;  %v1844_v45 = vcombine.high %v1819_v63, %v1835_v12  ;;  %v1263_v46 = vcombine.high %v1245_v13, %v2724_v7  ;;  %v1512_v49 = vcombine.high %v1494_v31, %v2724_v7 }
  0x23   :  { %606 = vrot.lane.b32.xlu0 %v2921_v51, %s2723_s16  ;;  %v1503_v52 = vrot.slane %v1495_v27, %v2935_v56  ;;  %v3039_v53 = vrot.slane %v1828_v28, %v2863_v30  ;;  %v3042_v57 = vrot.slane %v1596_v33, %v2935_v56  ;;  %v1597_v58 = vcombine.high %v1572_v21, %v1588_v22 }
  0x24   :  { %v1565_v59 = vcombine.high %v2886_v42, %v2904_v47  ;;  %v1581_v60 = vcombine.high %v2891_v43, %v2909_v48  ;;  %v2386_v61 = vpack.i.bf16 %v1494_v31, %v1245_v13  ;;  %v2381_v62 = vpack.i.bf16 %v1511_v32, %v1262_v18 }
  0x25   :  { %4143 = vst [vmem:[#allocation8_spill] sm:$0xff] %v3042_v57  ;;  %v1254_v63 = vrot.slane %v1246_v37, %v2935_v56  ;;  %v2406_v9 = vpack.i.bf16 %v1510_v41, %v1261_v40  ;;  %v1875_v11 = vcombine.high %v3033_v44, %v2724_v7  ;;  %v3056_v12 = vcombine.high %v1503_v52, %v2724_v7 }
  0x26   :  { %612 = vrot.lane.b32.xlu1 %v2957_v5, %s2723_s16  ;;  %v3059_v42 = vrot.slane %v1844_v45, %v2935_v56  ;;  %v2391_v43 = vpack.i.bf16 %v1512_v49, %v1263_v46  ;;  %v20_v48 = vcombine.high %v2849_v23, %v2878_v36  ;;  %v36_v1 = vcombine.high %v2840_v20, %v2873_v35 }
  0x27   :  { %610 = vrot.lane.b32.xlu0 %v2962_v8, %s2723_s16  ;;  %v1264_v47 = vcombine.high %v1254_v63, %v2724_v7  ;;  %v1628_v6 = vcombine.high %v3042_v57, %v2724_v7  ;;  %v3069_v16 = vrot.slane %v1597_v58, %v2935_v56  ;;  %v1579_v21 = vrot.slane %v1565_v59, %v2863_v30 }
  0x28   :  { %v1595_v22 = vrot.slane %v1581_v60, %v2863_v30  ;;  %v34_v24 = vrot.slane %v20_v48, %v2863_v30  ;;  %v50_v25 = vrot.slane %v36_v1, %v2863_v30  ;;  %v379_v26 = vcombine.high %v2921_v51, %v2962_v8 }
  0x29   :  { %v19_v27 = vcombine.low %v2849_v23, %v2878_v36  ;;  %v395_v28 = vcombine.high %v2916_v50, %v2957_v5  ;;  %v2396_v31 = vpack.i.bf16 %v1503_v52, %v1254_v63  ;;  %v35_v32 = vcombine.low %v2840_v20, %v2873_v35 }
  0x2a   :  { %961 = vrot.lane.b32.xlu1 %v2996_v10, %s2723_s16  ;;  %v67_v33 = vcombine.low %v34_v24, %v50_v25  ;;  %v393_v13 = vrot.slane %v379_v26, %v2863_v30  ;;  %v1629_v18 = vcombine.high %v3069_v16, %v2724_v7  ;;  %v1876_v37 = vcombine.high %v3059_v42, %v2724_v7 }
  0x2b   :  { %959 = vrot.lane.b32.xlu0 %v3001_v19, %s2723_s16  ;;  %v1859_v45 = vcombine.low %v3011_v34, %v3039_v53  ;;  %v409_v23 = vrot.slane %v395_v28, %v2863_v30  ;;  %v2416_v20 = vpack.i.bf16 %v1875_v11, %v1628_v6  ;;  %v2401_v35 = vpack.i.bf16 %v3056_v12, %v1264_v47 }
  0x2c   :  { %v1612_v36 = vcombine.low %v1579_v21, %v1595_v22  ;;  %v378_v46 = vcombine.low %v2921_v51, %v2962_v8  ;;  %v394_v49 = vcombine.low %v2916_v50, %v2957_v5  ;;  %v3101_v52 = vrot.slane %v67_v33, %v2935_v56 }
  0x2d   :  { %v426_v58 = vcombine.low %v393_v13, %v409_v23  ;;  %v1265_v59 = vcombine.high %v1261_v40, %v2724_v7  ;;  %v1514_v60 = vcombine.high %v1510_v41, %v2724_v7  ;;  %v2426_v63 = vpack.i.bf16 %v1876_v37, %v1629_v18 }
  0x2e   :  { %965 = vrot.lane.b32.xlu1 %v3023_v38, %s2723_s16  ;;  %v3113_v50 = vcombine.high %v3101_v52, %v2724_v7  ;;  %v1620_v5 = vrot.slane %v1612_v36, %v2935_v56  ;;  %v27_v8 = vrot.slane %v19_v27, %v2863_v30  ;;  %v386_v40 = vrot.slane %v378_v46, %v2863_v30 }
  0x2f   :  { %963 = vrot.lane.b32.xlu0 %v3028_v39, %s2723_s16  ;;  %s2727_s16 = smov 16   ;;  %v3109_v51 = vrot.slane %v426_v58, %v2935_v56  ;;  %v402_v41 = vrot.slane %v394_v49, %v2863_v30  ;;  %v68_v47 = vcombine.high %v34_v24, %v50_v25  ;;  %v427_v48 = vcombine.high %v393_v13, %v409_v23 }
  0x30   :  { %v2411_v1 = vpack.i.bf16 %v1514_v60, %v1265_v59  ;;  %v2421_v24 = vpack.i.bf16 %v3059_v42, %v3069_v16  ;;  %v1630_v23 = vcombine.high %v1620_v5, %v2724_v7  ;;  %v748_v36 = vcombine.low %v2996_v10, %v3023_v38 }
  0x31   :  { %v3126_v11 = vcombine.high %v3109_v51, %v2724_v7  ;;  %v3135_v27 = vrot.slane %v68_v47, %v2935_v56  ;;  %v3138_v28 = vrot.slane %v427_v48, %v2935_v56  ;;  %v411_v13 = vcombine.high %v386_v40, %v402_v41 }
  0x32   :  { %2387 = vrot.lane.b32.xlu1 %v2386_v61, %s2727_s16  ;;  %v1613_v61 = vcombine.high %v1579_v21, %v1595_v22  ;;  %v410_v21 = vcombine.low %v386_v40, %v402_v41  ;;  %v3174_v58 = vrot.slane %v748_v36, %v2863_v30  ;;  %v733_v47 = vcombine.high %v3001_v19, %v3028_v39 }
  0x33   :  { %2382 = vrot.lane.b32.xlu0 %v2381_v62, %s2728_s25  ;;  %v1860_v62 = vcombine.high %v3011_v34, %v3039_v53  ;;  %v43_v34 = vrot.slane %v35_v32, %v2863_v30  ;;  %4144 = vst [vmem:[#allocation9_spill] sm:$0xff] %v3135_v27  ;;  %4145 = vst [vmem:[#allocation10_spill] sm:$0xff] %v3138_v28  ;;  %v3146_v18 = vcombine.high %v3135_v27, %v2724_v7  ;;  %vm130_vm9 = vcmask 517120  }
  0x34   :  { %v1627_v12 = vrot.slane %v1613_v61, %v2935_v56  ;;  %v3150_v37 = vcombine.high %v3138_v28, %v2724_v7  ;;  %v3158_v16 = vrot.slane %v410_v21, %v2935_v56  ;;  %v749_v48 = vcombine.high %v2996_v10, %v3023_v38  ;;  %v2327_v10 = vld [vmem:[%s4120_s0 + $0x151] sm:$0xff] }
  0x35   :  { %v51_v6 = vcombine.low %v27_v8, %v43_v34  ;;  %v52_v32 = vcombine.high %v27_v8, %v43_v34  ;;  %v2329_v38 = vld [vmem:[%s4120_s0 + $0x171] sm:$0xff]  ;;  %vm1309_vm10 = vcmask 1043970   ;;  %vm1191_vm11 = vcmask 1041920  }
  0x36   :  { %2392 = vrot.lane.b32.xlu1 %v2391_v43, %s2729_s26  ;;  %v1874_v43 = vrot.slane %v1860_v62, %v2935_v56  ;;  %4147 = vst [vmem:[#allocation12_spill] sm:$0xff] %v3158_v16  ;;  %v425_v62 = vrot.slane %v411_v13, %v2935_v56  ;;  %v1942_v36 = vcombine.low %v2327_v10, %v2329_v38  ;;  %vm2194_vm12 = vcmask 1041408  }
  0x37   :  { %2407 = vrot.lane.b32.xlu0 %v2406_v9, %s2730_s27  ;;  %v1867_v9 = vrot.slane %v1859_v45, %v2935_v56  ;;  %v1631_v45 = vcombine.high %v1627_v12, %v2724_v7  ;;  %v3155_v42 = vrot.slane %v51_v6, %v2935_v56  ;;  %v66_v61 = vrot.slane %v52_v32, %v2935_v56 }
  0x38   :  { %v1878_v25 = vcombine.high %v1874_v43, %v2724_v7  ;;  %v2441_v33 = vpack.i.bf16 %v1874_v43, %v1627_v12  ;;  %v443_v41 = vcombine.high %v425_v62, %v2724_v7  ;;  %v3203_v6 = vrot.slane %v749_v48, %v2863_v30  ;;  %v2267_v48 = vld [vmem:[%s4120_s0 + $0x40] sm:$0xff] }
  0x39   :  { %v2431_v26 = vpack.i.bf16 %v1867_v9, %v1620_v5  ;;  %4146 = vst [vmem:[#allocation11_spill] sm:$0xff] %v3155_v42  ;;  %v84_v34 = vcombine.high %v66_v61, %v2724_v7  ;;  %v2456_v40 = vpack.i.bf16 %v66_v61, %v425_v62  ;;  %v1943_v32 = vcombine.high %v2327_v10, %v2329_v38  ;;  %v2268_v38 = vld [vmem:[%s4120_s0 + $0x50] sm:$0xff] }
  0x3a   :  { %2397 = vrot.lane.b32.xlu1 %v2396_v31, %s2731_s28  ;;  %v1877_v31 = vcombine.high %v1867_v9, %v2724_v7  ;;  %v2446_v59 = vpack.i.bf16 %v1878_v25, %v1631_v45  ;;  %v442_v9 = vcombine.high %v3158_v16, %v2724_v7  ;;  %4149 = vst [vmem:[#allocation14_spill] sm:$0xff] %v3203_v6  ;;  %vm2190_vm13 = vcmask 293888  }
  0x3b   :  { %2417 = vrot.lane.b32.xlu0 %v2416_v20, %s2728_s25  ;;  %v2461_v43 = vpack.i.bf16 %v84_v34, %v443_v41  ;;  %v1957_v62 = vrot.slane %v1943_v32, %v2863_v30  ;;  %v3255_v32 = vrot.slane %v1129_v2, %v2935_v56 }
  0x3c   :  { %v2436_v60 = vpack.i.bf16 %v1877_v31, %v1630_v23 }
  0x3e   :  { %2402 = vrot.lane.b32.xlu1 %v2401_v35, %s2732_s29  ;;  %v732_v35 = vcombine.low %v3001_v19, %v3028_v39  ;;  %v2328_v19 = vld [vmem:[%s4120_s0 + $0x161] sm:$0xff] }
  0x3f   :  { %2427 = vrot.lane.b32.xlu0 %v2426_v63, %s2729_s26  ;;  %v83_v63 = vcombine.high %v3155_v42, %v2724_v7 }
  0x40   :  { %v3171_v49 = vrot.slane %v732_v35, %v2863_v30 }
  0x41   :  { %v2451_v12 = vpack.i.bf16 %v83_v63, %v442_v9 }
  0x42   :  { %2412 = vrot.lane.b32.xlu1 %v2411_v1, %s2733_s30  ;;  %v3200_v1 = vrot.slane %v733_v47, %v2863_v30  ;;  %v3231_v47 = vrot.slane %v1942_v36, %v2863_v30 }
  0x43   :  { %2432 = vrot.lane.b32.xlu0 %v2431_v26, %s2731_s28 }
  0x44   :  { %4148 = vst [vmem:[#allocation13_spill] sm:$0xff] %v3200_v1 }
  0x46   :  { %2422 = vrot.lane.b32.xlu1 %v2421_v24, %s2727_s16  ;;  %v2326_v24 = vld [vmem:[%s4120_s0 + $0x141] sm:$0xff] }
  0x47   :  { %2442 = vrot.lane.b32.xlu0 %v2441_v33, %s2730_s27  ;;  %v1927_v31 = vcombine.high %v2326_v24, %v2328_v19  ;;  %v1926_v35 = vcombine.low %v2326_v24, %v2328_v19  ;;  %v3240_v19 = vrot.slane %v1114_v0, %v2935_v56  ;;  %v3261_v0 = vrot.slane %v1130_v3, %v2935_v56 }
  0x49   :  { %v1941_v61 = vrot.slane %v1927_v31, %v2863_v30  ;;  %v1148_v16 = vcombine.high %v3261_v0, %v2724_v7 }
  0x4a   :  { %2437 = vrot.lane.b32.xlu1 %v2436_v60, %s2732_s29 }
  0x4b   :  { %2447 = vrot.lane.b32.xlu0 %v2446_v59, %s2733_s30  ;;  %v1975_v2 = vcombine.high %v1941_v61, %v1957_v62 }
  0x4e   :  { %2452 = vrot.lane.b32.xlu1 %v2451_v12, %s2728_s25 }
  0x4f   :  { %2457 = vrot.lane.b32.xlu0 %v2456_v40, %s2727_s16 }
  0x53   :  { %2462 = vrot.lane.b32.xlu0 %v2461_v43, %s2729_s26  ;;  %v3228_v43 = vrot.slane %v1926_v35, %v2863_v30 }
  0x55   :  { %v1959_v4 = vcombine.high %v3228_v43, %v3231_v47 }
  0x74   :  { %v1324_v39 = vpop.permute.xlu1 %1323 }
  0x75   :  { %v1320_v25 = vpop.permute.xlu0 %1319 }
  0x76   :  { %v1331_v33 = vcombine.low %v1320_v25, %v1324_v39  ;;  %v1332_v13 = vcombine.high %v1320_v25, %v1324_v39  ;;  %v2269_v39 = vld [vmem:[%s4120_s0 + $0x60] sm:$0xff]  ;;  %v2270_v25 = vld [vmem:[%s4120_s0 + $0x70] sm:$0xff] }
  0x77   :  { %v137_v15 = vcombine.low %v2267_v48, %v2269_v39  ;;  %v153_v3 = vcombine.low %v2268_v38, %v2270_v25 }
  0x78   :  { %v1326_v45 = vpop.permute.xlu1 %1325  ;;  %v1339_v63 = vrot.slane %v1331_v33, %v2863_v30  ;;  %v1346_v9 = vrot.slane %v1332_v13, %v2863_v30  ;;  %v1974_v33 = vcombine.low %v1941_v61, %v1957_v62 }
  0x79   :  { %v1322_v23 = vpop.permute.xlu0 %1321 }
  0x7a   :  { %v1347_v59 = vcombine.low %v1322_v23, %v1326_v45  ;;  %v1348_v60 = vcombine.high %v1322_v23, %v1326_v45  ;;  %v3273_v23 = vrot.slane %v1113_v29, %v2935_v56 }
  0x7c   :  { %v1355_v34 = vrot.slane %v1347_v59, %v2863_v30  ;;  %v1362_v40 = vrot.slane %v1348_v60, %v2863_v30  ;;  %v1686_v41 = vpop.permute.xlu1 %1685  ;;  %4150 = vst [vmem:[#allocation15_spill] sm:$0xff] %v3273_v23  ;;  %v138_v59 = vcombine.high %v2267_v48, %v2269_v39  ;;  %v3294_v48 = vrot.slane %v153_v3, %v2863_v30 }
  0x7d   :  { %v1684_v12 = vpop.permute.xlu0 %1683  ;;  %v154_v39 = vcombine.high %v2268_v38, %v2270_v25 }
  0x7e   :  { %v1364_v24 = vcombine.high %v1339_v63, %v1355_v34  ;;  %v1379_v10 = vcombine.low %v1346_v9, %v1362_v40  ;;  %v1380_v31 = vcombine.high %v1346_v9, %v1362_v40 }
  0x80   :  { %v3264_v13 = vrot.slane %v1364_v24, %v2935_v56  ;;  %v3267_v45 = vrot.slane %v1379_v10, %v2935_v56  ;;  %v1690_v35 = vpop.permute.xlu1 %1689  ;;  %v1363_v10 = vcombine.low %v1339_v63, %v1355_v34  ;;  %v3282_v55 = vrot.slane %v1380_v31, %v2935_v56 }
  0x81   :  { %v1688_v36 = vpop.permute.xlu0 %1687  ;;  %v1711_v60 = vcombine.low %v1686_v41, %v1690_v35  ;;  %v1712_v9 = vcombine.high %v1686_v41, %v1690_v35 }
  0x82   :  { %v1695_v40 = vcombine.low %v1684_v12, %v1688_v36  ;;  %v1696_v24 = vcombine.high %v1684_v12, %v1688_v36  ;;  %v2466_v21 = vpack.i.bf16 %v3264_v13, %v3240_v19  ;;  %v2471_v54 = vpack.i.bf16 %v3267_v45, %v3255_v32 }
  0x83   :  { %v1719_v29 = vrot.slane %v1711_v60, %v2863_v30  ;;  %v1726_v61 = vrot.slane %v1712_v9, %v2863_v30  ;;  %v3291_v12 = vrot.slane %v137_v15, %v2863_v30  ;;  %v3297_v36 = vrot.slane %v1974_v33, %v2935_v56 }
  0x84   :  { %v1703_v62 = vrot.slane %v1695_v40, %v2863_v30  ;;  %v1710_v41 = vrot.slane %v1696_v24, %v2863_v30  ;;  %2467 = vrot.lane.b32.xlu0 %v2466_v21, %s2727_s16  ;;  %2472 = vrot.lane.b32.xlu1 %v2471_v54, %s2731_s28  ;;  %v2049_v63 = vpop.permute.xlu1 %2048  ;;  %v3300_v60 = vrot.slane %v1975_v2, %v2935_v56 }
  0x85   :  { %v2047_v34 = vpop.permute.xlu0 %2046  ;;  %v3303_v21 = vrot.slane %v1363_v10, %v2935_v56  ;;  %v2481_v15 = vpack.i.bf16 %v3282_v55, %v3261_v0  ;;  %v3308_v40 = vrot.slane %v1959_v4, %v2935_v56  ;;  %v1145_v33 = vcombine.high %v3273_v23, %v2724_v7  ;;  %v3495_v23 = vld [vmem:[%s4120_s0 + $0x71] sm:$0xff] }
  0x86   :  { %v1728_v31 = vcombine.high %v1703_v62, %v1719_v29  ;;  %v1743_v35 = vcombine.low %v1710_v41, %v1726_v61  ;;  %v1744_v9 = vcombine.high %v1710_v41, %v1726_v61  ;;  %v1958_v2 = vcombine.low %v3228_v43, %v3231_v47 }
  0x87   :  { %4151 = vst [vmem:[#allocation16_spill] sm:$0xff] %v3303_v21  ;;  %v1727_v3 = vcombine.low %v1703_v62, %v1719_v29  ;;  %v170_v4 = vcombine.high %v3291_v12, %v3294_v48  ;;  %v152_v54 = vrot.slane %v138_v59, %v2863_v30  ;;  %v168_v61 = vrot.slane %v154_v39, %v2863_v30 }
  0x88   :  { %v3311_v38 = vrot.slane %v1743_v35, %v2935_v56  ;;  %v3314_v25 = vrot.slane %v1728_v31, %v2935_v56  ;;  %2482 = vrot.lane.b32.xlu0 %v2481_v15, %s2730_s27  ;;  %v2053_v24 = vpop.permute.xlu1 %2052  ;;  %v1395_v47 = vcombine.high %v3303_v21, %v2724_v7  ;;  %v3332_v29 = vrot.slane %v1744_v9, %v2935_v56  ;;  %v3490_v21 = vld [vmem:[%s4120_s0 + $0x61] sm:$0xff] }
  0x89   :  { %v2051_v10 = vpop.permute.xlu0 %2050  ;;  %v2074_v41 = vcombine.low %v2049_v63, %v2053_v24  ;;  %v2075_v31 = vcombine.high %v2049_v63, %v2053_v24  ;;  %v1146_v9 = vcombine.high %v3240_v19, %v2724_v7  ;;  %v3347_v24 = vrot.slane %v1958_v2, %v2935_v56 }
  0x8a   :  { %v2058_v35 = vcombine.low %v2047_v34, %v2051_v10  ;;  %v2059_v26 = vcombine.high %v2047_v34, %v2051_v10  ;;  %v2486_v46 = vpack.i.bf16 %v3297_v36, %v3311_v38  ;;  %v2476_v43 = vpack.i.bf16 %v3308_v40, %v3314_v25 }
  0x8b   :  { %v2082_v59 = vrot.slane %v2074_v41, %v2863_v30  ;;  %v2089_v62 = vrot.slane %v2075_v31, %v2863_v30  ;;  %4152 = vst [vmem:[#allocation17_spill] sm:$0xff] %v3347_v24  ;;  %v3350_v10 = vrot.slane %v1727_v3, %v2935_v56  ;;  %v3357_v20 = vrot.slane %v170_v4, %v2935_v56 }
  0x8c   :  { %v2066_v63 = vrot.slane %v2058_v35, %v2863_v30  ;;  %v2073_v34 = vrot.slane %v2059_v26, %v2863_v30  ;;  %2487 = vrot.lane.b32.xlu0 %v2486_v46, %s2731_s28  ;;  %2477 = vrot.lane.b32.xlu1 %v2476_v43, %s2727_s16  ;;  %v3340_v39 = vpop.permute.xlu1 %258  ;;  %v1396_v26 = vcombine.high %v3264_v13, %v2724_v7 }
  0x8d   :  { %v3342_v15 = vpop.permute.xlu0 %256  ;;  %4153 = vst [vmem:[#allocation18_spill] sm:$0xff] %v3350_v10  ;;  %v185_v46 = vcombine.low %v152_v54, %v168_v61  ;;  %v2516_v35 = vpack.i.bf16 %v1395_v47, %v1145_v33  ;;  %v2491_v43 = vpack.i.bf16 %v3300_v60, %v3332_v29  ;;  %v1990_v13 = vcombine.high %v3347_v24, %v2724_v7  ;;  %v3485_v24 = vld [vmem:[%s4120_s0 + $0x51] sm:$0xff] }
  0x8e   :  { %v2091_v41 = vcombine.high %v2066_v63, %v2082_v59  ;;  %v2106_v31 = vcombine.low %v2073_v34, %v2089_v62  ;;  %v169_v33 = vcombine.low %v3291_v12, %v3294_v48  ;;  %v2521_v47 = vpack.i.bf16 %v1396_v26, %v1146_v9 }
  0x8f   :  { %v1759_v4 = vcombine.high %v3350_v10, %v2724_v7  ;;  %v186_v5 = vcombine.high %v152_v54, %v168_v61  ;;  %v2107_v8 = vcombine.high %v2073_v34, %v2089_v62  ;;  %v1147_v61 = vcombine.high %v3255_v32, %v2724_v7 }
  0x90   :  { %v3360_v19 = vrot.slane %v2091_v41, %v2935_v56  ;;  %2517 = vrot.lane.b32.xlu0 %v2516_v35, %s2728_s25  ;;  %2492 = vrot.lane.b32.xlu1 %v2491_v43, %s2730_s27  ;;  %v3364_v2 = vpop.permute.xlu1 %262  ;;  %v193_v41 = vrot.slane %v185_v46, %v2935_v56  ;;  %v2090_v35 = vcombine.low %v2066_v63, %v2082_v59 }
  0x91   :  { %v3366_v3 = vpop.permute.xlu0 %260  ;;  %v2114_v22 = vrot.slane %v2106_v31, %v2935_v56  ;;  %v284_v53 = vcombine.low %v3340_v39, %v3364_v2  ;;  %v1397_v59 = vcombine.high %v3267_v45, %v2724_v7  ;;  %v200_v62 = vrot.slane %v186_v5, %v2935_v56 }
  0x92   :  { %v2496_v43 = vpack.i.bf16 %v3357_v20, %v3360_v19  ;;  %v268_v12 = vcombine.low %v3342_v15, %v3366_v3  ;;  %v3394_v63 = vrot.slane %v169_v33, %v2935_v56  ;;  %v3397_v34 = vrot.slane %v2090_v35, %v2935_v56 }
  0x93   :  { %v2526_v9 = vpack.i.bf16 %v1990_v13, %v1759_v4  ;;  %v2501_v26 = vpack.i.bf16 %v193_v41, %v2114_v22  ;;  %v2121_v46 = vrot.slane %v2107_v8, %v2935_v56  ;;  %v3401_v31 = vrot.slane %v284_v53, %v2863_v30 }
  0x94   :  { %2522 = vrot.lane.b32.xlu0 %v2521_v47, %s2729_s26  ;;  %2497 = vrot.lane.b32.xlu1 %v2496_v43, %s2727_s16  ;;  %v3384_v48 = vpop.permute.xlu1 %608  ;;  %4154 = vst [vmem:[#allocation19_spill] sm:$0xff] %v3394_v63  ;;  %4155 = vst [vmem:[#allocation20_spill] sm:$0xff] %v3397_v34  ;;  %v3404_v32 = vrot.slane %v268_v12, %v2863_v30  ;;  %v2531_v33 = vpack.i.bf16 %v1397_v59, %v1147_v61 }
  0x95   :  { %v3386_v54 = vpop.permute.xlu0 %606  ;;  %v2506_v53 = vpack.i.bf16 %v200_v62, %v2121_v46  ;;  %v201_v47 = vcombine.high %v3394_v63, %v2724_v7  ;;  %v2122_v4 = vcombine.high %v3397_v34, %v2724_v7  ;;  %v1762_v34 = vcombine.high %v3332_v29, %v2724_v7  ;;  %v3465_v29 = vld [vmem:[%s4120_s0 + $0xf0] sm:$0xff] }
  0x96   :  { %v301_v35 = vcombine.high %v3404_v32, %v3401_v31  ;;  %v1760_v63 = vcombine.high %v3314_v25, %v2724_v7  ;;  %v1991_v10 = vcombine.high %v3308_v40, %v2724_v7  ;;  %v203_v25 = vcombine.high %v193_v41, %v2724_v7 }
  0x97   :  { %v2124_v40 = vcombine.high %v2114_v22, %v2724_v7  ;;  %v1398_v42 = vcombine.high %v3282_v55, %v2724_v7  ;;  %v2125_v27 = vcombine.high %v2121_v46, %v2724_v7  ;;  %v285_v55 = vcombine.high %v3340_v39, %v3364_v2 }
  0x98   :  { %2527 = vrot.lane.b32.xlu0 %v2526_v9, %s2728_s25  ;;  %2502 = vrot.lane.b32.xlu1 %v2501_v26, %s2731_s28  ;;  %v3408_v5 = vpop.permute.xlu1 %612  ;;  %v2551_v26 = vpack.i.bf16 %v201_v47, %v2122_v4  ;;  %v3454_v47 = vld [vmem:[%s4120_s0 + $0xd0] sm:$0xff]  ;;  %v3470_v4 = vld [vmem:[%s4120_s0 + $0x41] sm:$0xff]  ;;  %v2536_v22 = vpack.i.bf16 %v1991_v10, %v1760_v63  ;;  %v1992_v10 = vcombine.high %v3297_v36, %v2724_v7 }
  0x99   :  { %v3410_v45 = vpop.permute.xlu0 %610  ;;  %v634_v13 = vcombine.low %v3384_v48, %v3408_v5  ;;  %v509_v1 = vcombine.low %v3454_v47, %v3465_v29  ;;  %v841_v17 = vcombine.low %v3470_v4, %v3490_v21  ;;  %v2566_v28 = vpack.i.bf16 %v203_v25, %v2124_v40 }
  0x9a   :  { %v618_v8 = vcombine.low %v3386_v54, %v3410_v45  ;;  %v619_v14 = vcombine.high %v3386_v54, %v3410_v45  ;;  %v1761_v36 = vcombine.high %v3311_v38, %v2724_v7  ;;  %v3553_v45 = vrot.slane %v285_v55, %v2863_v30 }
  0x9b   :  { %v3423_v43 = vrot.slane %v634_v13, %v2863_v30  ;;  %v1993_v13 = vcombine.high %v3300_v60, %v2724_v7  ;;  %v3460_v60 = vld [vmem:[%s4120_s0 + $0xe0] sm:$0xff]  ;;  %v517_v0 = vrot.slane %v509_v1, %v2863_v30  ;;  %v849_v54 = vrot.slane %v841_v17, %v2863_v30 }
  0x9c   :  { %v3426_v12 = vrot.slane %v618_v8, %v2863_v30  ;;  %2532 = vrot.lane.b32.xlu0 %v2531_v33, %s2732_s29  ;;  %2507 = vrot.lane.b32.xlu1 %v2506_v53, %s2730_s27  ;;  %v3430_v61 = vpop.permute.xlu1 %961  ;;  %v3441_v8 = vrot.slane %v301_v35, %v2935_v56  ;;  %v3449_v53 = vld [vmem:[%s4120_s0 + $0xc0] sm:$0xff]  ;;  %v2541_v1 = vpack.i.bf16 %v1398_v42, %v1148_v16  ;;  %s2734_s0 = smov 64  }
  0x9d   :  { %v3432_v59 = vpop.permute.xlu0 %959  ;;  %v2556_v57 = vpack.i.bf16 %v1993_v13, %v1762_v34  ;;  %v493_v6 = vcombine.low %v3449_v53, %v3460_v60  ;;  %v857_v34 = vcombine.low %v3485_v24, %v3495_v23 }
  0x9e   :  { %v651_v9 = vcombine.high %v3426_v12, %v3423_v43 }
  0x9f   :  { %v865_v63 = vrot.slane %v857_v34, %v2863_v30 }
  0xa0   :  { %v3444_v33 = vrot.slane %v651_v9, %v2935_v56  ;;  %2552 = vrot.lane.b32.xlu0 %v2551_v26, %s2728_s25  ;;  %v3472_v35 = vpop.permute.xlu1 %965 }
  0xa1   :  { %v3474_v9 = vpop.permute.xlu0 %963  ;;  %v873_v2 = vcombine.low %v849_v54, %v865_v63  ;;  %v874_v38 = vcombine.high %v849_v54, %v865_v63  ;;  %v4157_v63 = vpack.i.bf16 %v3113_v50, %v3126_v11 }
  0xa2   :  { %v2511_v26 = vpack.i.bf16 %v3444_v33, %v3441_v8  ;;  %v683_v50 = vcombine.high %v3444_v33, %v2724_v7  ;;  %v333_v33 = vcombine.high %v3441_v8, %v2724_v7 }
  0xa3   :  { %v3576_v34 = vrot.slane %v873_v2, %v2935_v56 }
  0xa4   :  { %2512 = vrot.lane.b32.xlu1 %v2511_v26, %s2727_s16  ;;  %2557 = vrot.lane.b32.xlu0 %v2556_v57, %s2733_s30  ;;  %v3509_v13 = vpop.permute.xlu1 %2387  ;;  %v204_v26 = vcombine.high %v200_v62, %v2724_v7  ;;  %v635_v57 = vcombine.high %v3384_v48, %v3408_v5  ;;  %v501_v62 = vrot.slane %v493_v6, %v2863_v30 }
  0xa5   :  { %v3511_v41 = vpop.permute.xlu0 %2382  ;;  %v269_v48 = vcombine.high %v3342_v15, %v3366_v3  ;;  %v650_v6 = vcombine.low %v3426_v12, %v3423_v43  ;;  %v300_v3 = vcombine.low %v3404_v32, %v3401_v31  ;;  %v2546_v31 = vpack.i.bf16 %v1992_v10, %v1761_v36 }
  0xa6   :  { %v525_v39 = vcombine.low %v501_v62, %v517_v0  ;;  %v3544_v15 = vrot.slane %v635_v57, %v2863_v30  ;;  %v2571_v17 = vpack.i.bf16 %v204_v26, %v2125_v27  ;;  %v526_v16 = vcombine.high %v501_v62, %v517_v0 }
  0xa7   :  { %v3556_v42 = vrot.slane %v269_v48, %v2863_v30  ;;  %v3564_v27 = vrot.slane %v650_v6, %v2935_v56  ;;  %v202_v32 = vcombine.high %v3357_v20, %v2724_v7  ;;  %v2123_v12 = vcombine.high %v3360_v19, %v2724_v7 }
  0xa8   :  { %2537 = vrot.lane.b32.xlu1 %v2536_v22, %s2729_s26  ;;  %2567 = vrot.lane.b32.xlu0 %v2566_v28, %s2732_s29  ;;  %v3535_v46 = vpop.permute.xlu1 %2392  ;;  %v3547_v28 = vrot.slane %v619_v14, %v2863_v30  ;;  %v3573_v40 = vrot.slane %v525_v39, %v2935_v56  ;;  %v3579_v22 = vrot.slane %v300_v3, %v2935_v56 }
  0xa9   :  { %v3537_v5 = vpop.permute.xlu0 %2407  ;;  %v494_v20 = vcombine.high %v3449_v53, %v3460_v60  ;;  %v510_v19 = vcombine.high %v3454_v47, %v3465_v29  ;;  %v316_v26 = vcombine.low %v3556_v42, %v3553_v45  ;;  %v4156_v57 = vpack.i.bf16 %v3101_v52, %v3109_v51 }
  0xaa   :  { %v666_v25 = vcombine.low %v3547_v28, %v3544_v15  ;;  %v540_v10 = vrot.slane %v526_v16, %v2935_v56  ;;  %v888_v62 = vrot.slane %v874_v38, %v2935_v56  ;;  %v2561_v53 = vpack.i.bf16 %v202_v32, %v2123_v12 }
  0xab   :  { %v682_v47 = vcombine.high %v3564_v27, %v2724_v7  ;;  %v842_v60 = vcombine.high %v3470_v4, %v3490_v21  ;;  %v858_v29 = vcombine.high %v3485_v24, %v3495_v23  ;;  %v3609_v51 = vcombine.high %v3573_v40, %v2724_v7 }
  0xac   :  { %2542 = vrot.lane.b32.xlu1 %v2541_v1, %s2733_s30  ;;  %2572 = vrot.lane.b32.xlu0 %v2571_v17, %s2733_s30  ;;  %v3559_v43 = vpop.permute.xlu1 %2397  ;;  %v3605_v52 = vrot.slane %v666_v25, %v2935_v56  ;;  %v905_v48 = vcombine.high %v3576_v34, %v2724_v7  ;;  %v3614_v54 = vcombine.high %v540_v10, %v2724_v7 }
  0xad   :  { %v3561_v14 = vpop.permute.xlu0 %2417  ;;  %v332_v21 = vcombine.high %v3579_v22, %v2724_v7  ;;  %v3620_v23 = vcombine.high %v888_v62, %v2724_v7  ;;  %v3623_v24 = vrot.slane %v494_v20, %v2863_v30  ;;  %v3626_v4 = vrot.slane %v510_v19, %v2863_v30 }
  0xae   :  { %v3633_v6 = vrot.slane %v316_v26, %v2935_v56  ;;  %v987_v1 = vcombine.low %v3430_v61, %v3472_v35  ;;  %v971_v36 = vcombine.low %v3432_v59, %v3474_v9  ;;  %v2420_v39 = vunpack.i.h.bf16 %v3561_v14 }
  0xaf   :  { %v2581_v3 = vpack.i.bf16 %v682_v47, %v332_v21  ;;  %v3647_v11 = vrot.slane %v842_v60, %v2863_v30  ;;  %v3650_v16 = vrot.slane %v858_v29, %v2863_v30  ;;  %v4158_v32 = vcombine.low %v3171_v49, %v3174_v58 }
  0xb0   :  { %2547 = vrot.lane.b32.xlu1 %v2546_v31, %s2732_s29  ;;  %2577 = vrot.lane.b32.xlu0 %v4156_v57, %s2731_s28  ;;  %v3594_v0 = vpop.permute.xlu1 %2402  ;;  %v2601_v38 = vpack.i.bf16 %v3605_v52, %v3633_v6  ;;  %v2611_v31 = vpack.i.bf16 %v540_v10, %v888_v62  ;;  %v2596_v25 = vpack.i.bf16 %v3609_v51, %v905_v48 }
  0xb1   :  { %v3596_v55 = vpop.permute.xlu0 %2427  ;;  %v3658_v12 = vrot.slane %v4158_v32, %v2935_v56  ;;  %v2631_v20 = vpack.i.bf16 %v3614_v54, %v3620_v23  ;;  %v995_v19 = vrot.slane %v987_v1, %v2863_v30  ;;  %v979_v26 = vrot.slane %v971_v36, %v2863_v30 }
  0xb2   :  { %v1907_v57 = vsel %vm115_vm0, %v3033_v44, %v2420_v39  ;;  %v2430_v10 = vunpack.i.h.bf16 %v3596_v55  ;;  %v541_v47 = vcombine.low %v3623_v24, %v3626_v4  ;;  %v889_v60 = vcombine.low %v3647_v11, %v3650_v16 }
  0xb3   :  { %v4159_v51 = vcombine.high %v3171_v49, %v3174_v58  ;;  %v3689_v48 = vcombine.high %v3658_v12, %v2724_v7  ;;  %v317_v36 = vcombine.high %v3556_v42, %v3553_v45  ;;  %v1004_v49 = vcombine.high %v979_v26, %v995_v19 }
  0xb4   :  { %2562 = vrot.lane.b32.xlu1 %v2561_v53, %s2729_s26  ;;  %2592 = vrot.lane.b32.xlu0 %v4157_v63, %s2732_s29  ;;  %v3640_v17 = vpop.permute.xlu1 %2412  ;;  %v2586_v53 = vpack.i.bf16 %v683_v50, %v333_v33  ;;  %v1003_v63 = vcombine.low %v979_v26, %v995_v19  ;;  %v3707_v32 = vrot.slane %v889_v60, %v2935_v56  ;;  %v2390_v54 = vunpack.i.h.bf16 %v3509_v13 }
  0xb5   :  { %v3642_v2 = vpop.permute.xlu0 %2432  ;;  %v3685_v44 = vrot.slane %v4159_v51, %v2935_v56  ;;  %v667_v42 = vcombine.high %v3547_v28, %v3544_v15  ;;  %v890_v33 = vcombine.high %v3647_v11, %v3650_v16  ;;  %v3724_v15 = vrot.slane %v317_v36, %v2935_v56 }
  0xb6   :  { %v2435_v21 = vunpack.i.h.bf16 %v3642_v2  ;;  %v3718_v26 = vrot.slane %v1003_v63, %v2935_v56  ;;  %v4160_v28 = vpack.i.bf16 %v3146_v18, %v3150_v37  ;;  %v334_v18 = vcombine.high %v3633_v6, %v2724_v7  ;;  %v4162_v63 = vld [vmem:[#allocation10_spill] sm:$0xff] }
  0xb7   :  { %v681_v51 = vrot.slane %v667_v42, %v2935_v56  ;;  %v2389_v37 = vunpack.i.l.bf16 %v3509_v13  ;;  %v4166_v42 = vld [vmem:[#allocation12_spill] sm:$0xff] }
  0xb8   :  { %2582 = vrot.lane.b32.xlu1 %v2581_v3, %s2728_s25  ;;  %2602 = vrot.lane.b32.xlu0 %v2601_v38, %s2731_s28  ;;  %v3674_v8 = vpop.permute.xlu1 %2422  ;;  %v3704_v38 = vrot.slane %v541_v47, %v2935_v56  ;;  %v1035_v36 = vcombine.high %v3718_v26, %v2724_v7 }
  0xb9   :  { %v3672_v62 = vpop.permute.xlu0 %2442  ;;  %v2425_v29 = vunpack.i.h.bf16 %v3674_v8 }
  0xba   :  { %v2445_v58 = vunpack.i.h.bf16 %v3672_v62  ;;  %v559_v13 = vcombine.high %v3704_v38, %v2724_v7 }
  0xbb   :  { %v1908_v1 = vsel %vm117_vm1, %v1907_v57, %v2425_v29  ;;  %v2384_v57 = vunpack.i.l.bf16 %v3511_v41 }
  0xbc   :  { %2587 = vrot.lane.b32.xlu1 %v2586_v53, %s2729_s26  ;;  %2612 = vrot.lane.b32.xlu0 %v2611_v31, %s2727_s16  ;;  %v1909_v39 = vsel %vm119_vm2, %v1908_v1, %v2430_v10  ;;  %v3701_v50 = vpop.permute.xlu1 %2437  ;;  %v542_v31 = vcombine.high %v3623_v24, %v3626_v4  ;;  %v3731_v24 = vrot.slane %v1004_v49, %v2935_v56  ;;  %v4164_v49 = vld [vmem:[#allocation7_spill] sm:$0xff] }
  0xbd   :  { %v3699_v3 = vpop.permute.xlu0 %2447  ;;  %v2440_v45 = vunpack.i.h.bf16 %v3701_v50  ;;  %v1910_v19 = vsel %vm121_vm3, %v1909_v39, %v2435_v21  ;;  %v684_v4 = vcombine.high %v3605_v52, %v2724_v7  ;;  %v2385_v21 = vunpack.i.h.bf16 %v3511_v41  ;;  %v4161_v52 = vld [vmem:[#allocation9_spill] sm:$0xff]  ;;  %v4165_v39 = vld [vmem:[#allocation11_spill] sm:$0xff] }
  0xbe   :  { %v4163_v1 = vpack.i.bf16 %v4161_v52, %v4162_v63  ;;  %v988_v41 = vcombine.high %v3430_v61, %v3472_v35  ;;  %v972_v61 = vcombine.high %v3432_v59, %v3474_v9  ;;  %v685_v35 = vcombine.high %v681_v51, %v2724_v7 }
  0xbf   :  { %v1911_v10 = vsel %vm123_vm4, %v1910_v19, %v2440_v45  ;;  %v2641_v19 = vpack.i.bf16 %v3731_v24, %v3685_v44  ;;  %v335_v59 = vcombine.high %v3724_v15, %v2724_v7  ;;  %v2399_v9 = vunpack.i.l.bf16 %v3559_v43 }
  0xc0   :  { %2597 = vrot.lane.b32.xlu1 %v2596_v25, %s2728_s25  ;;  %2622 = vrot.lane.b32.xlu0 %v4160_v28, %s2733_s30  ;;  %v2453_v16 = vpop.permute.xlu1 %2452  ;;  %v3736_v25 = vsel %vm125_vm5, %v1911_v10, %v2445_v58  ;;  %v1294_v58 = vsel %vm115_vm0, %v4164_v49, %v2384_v57  ;;  %v556_v52 = vrot.slane %v542_v31, %v2935_v56 }
  0xc1   :  { %v2458_v11 = vpop.permute.xlu0 %2457  ;;  %v2455_v60 = vunpack.i.h.bf16 %v2453_v16  ;;  %v2454_v29 = vunpack.i.l.bf16 %v2453_v16  ;;  %v2394_v16 = vunpack.i.l.bf16 %v3535_v46  ;;  %v1295_v23 = vsel %vm117_vm1, %v1294_v58, %v2389_v37 }
  0xc2   :  { %v2460_v53 = vunpack.i.h.bf16 %v2458_v11  ;;  %v2459_v47 = vunpack.i.l.bf16 %v2458_v11  ;;  %v2616_v11 = vpack.i.bf16 %v684_v4, %v334_v18  ;;  %v2395_v37 = vunpack.i.h.bf16 %v3535_v46 }
  0xc3   :  { %v116_v45 = vsel %vm115_vm0, %v4165_v39, %v2455_v60  ;;  %v474_v6 = vsel %vm115_vm0, %v4166_v42, %v2454_v29  ;;  %v904_v63 = vrot.slane %v890_v33, %v2935_v56  ;;  %v2651_v49 = vpack.i.bf16 %v685_v35, %v335_v59 }
  0xc4   :  { %2607 = vrot.lane.b32.xlu1 %v4163_v1, %s2730_s27  ;;  %2632 = vrot.lane.b32.xlu0 %v2631_v20, %s2729_s26  ;;  %v118_v57 = vsel %vm117_vm1, %v116_v45, %v2460_v53  ;;  %v475_v28 = vsel %vm117_vm1, %v474_v6, %v2459_v47  ;;  %v2626_v20 = vpack.i.bf16 %v1035_v36, %v3689_v48  ;;  %v4167_v53 = vld [vmem:[#allocation6_spill] sm:$0xff]  ;;  %v2404_v39 = vunpack.i.l.bf16 %v3594_v0 }
  0xc5   :  { %v2463_v10 = vpop.permute.xlu0 %2462  ;;  %v1543_v4 = vsel %vm115_vm0, %v4167_v53, %v2385_v21  ;;  %v907_v48 = vcombine.high %v3707_v32, %v2724_v7  ;;  %v1296_v21 = vsel %vm119_vm2, %v1295_v23, %v2394_v16  ;;  %v1002_v1 = vrot.slane %v988_v41, %v2863_v30  ;;  %v4169_v16 = vld [vmem:[#allocation14_spill] sm:$0xff] }
  0xc6   :  { %v2465_v60 = vunpack.i.h.bf16 %v2463_v10  ;;  %v2464_v29 = vunpack.i.l.bf16 %v2463_v10  ;;  %v986_v36 = vrot.slane %v972_v61, %v2863_v30  ;;  %v1544_v58 = vsel %vm117_vm1, %v1543_v4, %v2390_v54 }
  0xc7   :  { %v2400_v46 = vunpack.i.h.bf16 %v3559_v43  ;;  %v1297_v31 = vsel %vm121_vm3, %v1296_v21, %v2399_v9  ;;  %v2661_v42 = vpack.i.bf16 %v559_v13, %v907_v48  ;;  %v2636_v33 = vpack.i.bf16 %v681_v51, %v3724_v15 }
  0xc8   :  { %2617 = vrot.lane.b32.xlu1 %v2616_v11, %s2732_s29  ;;  %v3776_v47 = vsel %vm119_vm2, %v118_v57, %v2465_v60  ;;  %v3779_v18 = vsel %vm119_vm2, %v475_v28, %v2464_v29  ;;  %2642 = vrot.lane.b32.xlu0 %v2641_v19, %s2727_s16  ;;  %v1020_v45 = vcombine.high %v986_v36, %v1002_v1  ;;  %v2409_v19 = vunpack.i.l.bf16 %v3537_v5 }
  0xc9   :  { %v1545_v6 = vsel %vm119_vm2, %v1544_v58, %v2395_v37  ;;  %v797_v30 = vcombine.high %v3685_v44, %v2724_v7  ;;  %v2646_v41 = vpack.i.bf16 %v3704_v38, %v3707_v32  ;;  %v2671_v10 = vpack.i.bf16 %v556_v52, %v904_v63  ;;  %v4168_v32 = vld [vmem:[#allocation13_spill] sm:$0xff] }
  0xca   :  { %v560_v57 = vcombine.high %v556_v52, %v2724_v7  ;;  %v1019_v28 = vcombine.low %v986_v36, %v1002_v1  ;;  %v1036_v43 = vcombine.high %v3731_v24, %v2724_v7  ;;  %v2405_v15 = vunpack.i.h.bf16 %v3594_v0 }
  0xcb   :  { %v1298_v51 = vsel %vm123_vm4, %v1297_v31, %v2404_v39  ;;  %v1034_v44 = vrot.slane %v1020_v45, %v2935_v56  ;;  %v1546_v11 = vsel %vm121_vm3, %v1545_v6, %v2400_v46  ;;  %v908_v38 = vcombine.high %v904_v63, %v2724_v7 }
  0xcc   :  { %2627 = vrot.lane.b32.xlu1 %v2626_v20, %s2728_s25  ;;  %2652 = vrot.lane.b32.xlu0 %v2651_v49, %s2733_s30  ;;  %v4170_v60 = vcombine.high %v4168_v32, %v4169_v16  ;;  %v2414_v61 = vunpack.i.l.bf16 %v3640_v17  ;;  %v2410_v24 = vunpack.i.h.bf16 %v3537_v5  ;;  %v1299_v0 = vsel %vm125_vm5, %v1298_v51, %v2409_v19 }
  0xcd   :  { %v2656_v35 = vpack.i.bf16 %v1036_v43, %v797_v30  ;;  %v1547_v54 = vsel %vm123_vm4, %v1546_v11, %v2405_v15  ;;  %v4171_v23 = vcombine.low %v4168_v32, %v4169_v16  ;;  %v1027_v53 = vrot.slane %v1019_v28, %v2935_v56 }
  0xce   :  { %v795_v29 = vrot.slane %v4170_v60, %v2935_v56  ;;  %v2681_v4 = vpack.i.bf16 %v560_v57, %v908_v38  ;;  %v1038_v59 = vcombine.high %v1034_v44, %v2724_v7  ;;  %v2415_v9 = vunpack.i.h.bf16 %v3640_v17 }
  0xcf   :  { %v788_v20 = vrot.slane %v4171_v23, %v2935_v56  ;;  %v1300_v13 = vsel %vm127_vm6, %v1299_v0, %v2414_v61  ;;  %v1548_v48 = vsel %vm125_vm5, %v1547_v54, %v2410_v24  ;;  %v1037_v56 = vcombine.high %v1027_v53, %v2724_v7 }
  0xd0   :  { %2637 = vrot.lane.b32.xlu1 %v2636_v33, %s2730_s27  ;;  %2662 = vrot.lane.b32.xlu0 %v2661_v42, %s2732_s29  ;;  %v799_v5 = vcombine.high %v795_v29, %v2724_v7  ;;  %v2345_v63 = vpack.c.bf16 %v1300_v13, %v1300_v13  ;;  %v1549_v1 = vsel %vm127_vm6, %v1548_v48, %v2415_v9  ;;  %v2419_v6 = vunpack.i.l.bf16 %v3561_v14 }
  0xd1   :  { %v2666_v37 = vpack.i.bf16 %v1027_v53, %v788_v20  ;;  %v798_v21 = vcombine.high %v788_v20, %v2724_v7  ;;  %v2347_v49 = vpack.c.bf16 %v1549_v1, %v1549_v1  ;;  %v2686_v39 = vpack.i.bf16 %v1034_v44, %v795_v29 }
  0xd2   :  { %v2691_v52 = vpack.i.bf16 %v1038_v59, %v799_v5  ;;  %v1305_v36 = vrot.slane %v2345_v63, 6  ;;  %v2424_v30 = vunpack.i.l.bf16 %v3674_v8  ;;  %v2429_v28 = vunpack.i.l.bf16 %v3596_v55 }
  0xd3   :  { %v2676_v17 = vpack.i.bf16 %v1037_v56, %v798_v21  ;;  %v1554_v58 = vrot.slane %v2347_v49, 6  ;;  %v2434_v44 = vunpack.i.l.bf16 %v3642_v2  ;;  %v2439_v8 = vunpack.i.l.bf16 %v3701_v50  ;;  %v4174_v49 = vld [vmem:[#allocation16_spill] sm:$0xff] }
  0xd4   :  { %2647 = vrot.lane.b32.xlu1 %v2646_v41, %s2731_s28  ;;  %2672 = vrot.lane.b32.xlu0 %v2671_v10, %s2730_s27  ;;  %v4172_v10 = vld [vmem:[#allocation8_spill] sm:$0xff]  ;;  %v2444_v16 = vunpack.i.l.bf16 %v3672_v62  ;;  %v2449_v61 = vunpack.i.l.bf16 %v3699_v3  ;;  %v2450_v50 = vunpack.i.h.bf16 %v3699_v3 }
  0xd5   :  { %v1660_v57 = vsel %vm115_vm0, %v4172_v10, %v2419_v6 }
  0xd6   :  { %v1661_v43 = vsel %vm117_vm1, %v1660_v57, %v2424_v30  ;;  %v3899_v3 = vsel %vm127_vm6, %v3736_v25, %v2450_v50  ;;  %v4176_v57 = vld [vmem:[#allocation18_spill] sm:$0xff] }
  0xd7   :  { %v1662_v11 = vsel %vm119_vm2, %v1661_v43, %v2429_v28 }
  0xd8   :  { %2657 = vrot.lane.b32.xlu1 %v2656_v35, %s2729_s26  ;;  %2682 = vrot.lane.b32.xlu0 %v2681_v4, %s2733_s30  ;;  %v1663_v32 = vsel %vm121_vm3, %v1662_v11, %v2434_v44  ;;  %v4173_v35 = vld [vmem:[#allocation15_spill] sm:$0xff]  ;;  %s2736_s26 = smov [#allocation3]  }
  0xd9   :  { %v1664_v55 = vsel %vm123_vm4, %v1663_v32, %v2439_v8 }
  0xda   :  { %v1665_v0 = vsel %vm125_vm5, %v1664_v55, %v2444_v16 }
  0xdb   :  { %v3892_v53 = vsel %vm127_vm6, %v1665_v0, %v2449_v61 }
  0xdc   :  { %2667 = vrot.lane.b32.xlu1 %v2666_v37, %s2731_s28  ;;  %2692 = vrot.lane.b32.xlu0 %v2691_v52, %s2733_s30  ;;  %v2348_v21 = vpack.c.bf16 %v3892_v53, %v3892_v53 }
  0xe0   :  { %2677 = vrot.lane.b32.xlu1 %v2676_v17, %s2732_s29  ;;  %1306 = vrot.lane.b32.xlu0 %v1305_v36, %s2734_s0 }
  0xe4   :  { %2687 = vrot.lane.b32.xlu1 %v2686_v39, %s2730_s27  ;;  %1555 = vrot.lane.b32.xlu0 %v1554_v58, %s2734_s0  ;;  %s2255_s27 = sshll.u32 %s2736_s26, 4  ;;  %s2256_s27 = int_to_ptr.vmem [resolvable:$true] %s2255_s27 }
  0xe5   :  { %s2699_s28 = scalar_lea.vmem %s2256_s27, 64  ;;  %p2704_p1 = scmp.lt.s32.totalorder %s2256_s27, %s2256_s27 }
  0xe6   :  { %p2700_p0 = scmp.ne.s32.totalorder %s2256_s27, %s2699_s28  ;;  %p2705_p2 = scmp.lt.s32.totalorder %s2699_s28, %s2699_s28 }
  0xe8   :  { %p2706_p3 = por %p2705_p2, %p2704_p1 }
  0xea   :  { %p2707_p4 = pnand %p2706_p3, %p2700_p0 }
  0xf6   :  { %v3849_v45 = vpop.permute.xlu0 %2467  ;;  %v3851_v46 = vpop.permute.xlu1 %2472 }
  0xf7   :  { %v2469_v62 = vunpack.i.l.bf16 %v3849_v45  ;;  %v2470_v56 = vunpack.i.h.bf16 %v3849_v45  ;;  %v2475_v52 = vunpack.i.h.bf16 %v3851_v46  ;;  %v2474_v63 = vunpack.i.l.bf16 %v3851_v46 }
  0xfa   :  { %v3853_v31 = vpop.permute.xlu0 %2482 }
  0xfb   :  { %v2485_v1 = vunpack.i.h.bf16 %v3853_v31  ;;  %v2484_v25 = vunpack.i.l.bf16 %v3853_v31 }
  0xfe   :  { %v3855_v42 = vpop.permute.xlu0 %2487  ;;  %v3857_v33 = vpop.permute.xlu1 %2477 }
  0xff   :  { %v2490_v36 = vunpack.i.h.bf16 %v3855_v42  ;;  %v2489_v30 = vunpack.i.l.bf16 %v3855_v42  ;;  %v2480_v45 = vunpack.i.h.bf16 %v3857_v33 }
 0x102   :  { %v2518_v41 = vpop.permute.xlu0 %2517  ;;  %v3861_v19 = vpop.permute.xlu1 %2492 }
 0x103   :  { %v2519_v29 = vunpack.i.l.bf16 %v2518_v41  ;;  %v2520_v4 = vunpack.i.h.bf16 %v2518_v41  ;;  %v4175_v41 = vld [vmem:[#allocation17_spill] sm:$0xff]  ;;  %v2495_v11 = vunpack.i.h.bf16 %v3861_v19  ;;  %v2494_v42 = vunpack.i.l.bf16 %v3861_v19 }
 0x105   :  { %v1177_v54 = vsel %vm115_vm0, %v4173_v35, %v2519_v29  ;;  %v1427_v58 = vsel %vm115_vm0, %v4174_v49, %v2520_v4 }
 0x106   :  { %v2523_v15 = vpop.permute.xlu0 %2522  ;;  %v3867_v51 = vpop.permute.xlu1 %2497  ;;  %v1178_v59 = vsel %vm117_vm1, %v1177_v54, %v2469_v62 }
 0x107   :  { %v2524_v23 = vunpack.i.l.bf16 %v2523_v15  ;;  %v2525_v39 = vunpack.i.h.bf16 %v2523_v15  ;;  %v2479_v15 = vunpack.i.l.bf16 %v3857_v33  ;;  %v2500_v16 = vunpack.i.h.bf16 %v3867_v51 }
 0x109   :  { %v1179_v13 = vsel %vm119_vm2, %v1178_v59, %v2524_v23 }
 0x10a   :  { %v2528_v14 = vpop.permute.xlu0 %2527  ;;  %v3872_v38 = vpop.permute.xlu1 %2502  ;;  %v1180_v10 = vsel %vm121_vm3, %v1179_v13, %v2474_v63 }
 0x10b   :  { %v2530_v9 = vunpack.i.h.bf16 %v2528_v14  ;;  %v2529_v48 = vunpack.i.l.bf16 %v2528_v14  ;;  %v1428_v14 = vsel %vm117_vm1, %v1427_v58, %v2470_v56  ;;  %v2505_v4 = vunpack.i.h.bf16 %v3872_v38 }
 0x10c   :  { %v1429_v32 = vsel %vm119_vm2, %v1428_v14, %v2525_v39 }
 0x10d   :  { %v2022_v46 = vsel %vm115_vm0, %v4175_v41, %v2530_v9  ;;  %v1791_v31 = vsel %vm115_vm0, %v4176_v57, %v2529_v48  ;;  %v1430_v59 = vsel %vm121_vm3, %v1429_v32, %v2475_v52  ;;  %v4178_v52 = vld [vmem:[#allocation20_spill] sm:$0xff] }
 0x10e   :  { %v3876_v60 = vpop.permute.xlu0 %2532  ;;  %v3880_v24 = vpop.permute.xlu1 %2507  ;;  %v1792_v33 = vsel %vm117_vm1, %v1791_v31, %v2479_v15  ;;  %v2023_v50 = vsel %vm117_vm1, %v2022_v46, %v2480_v45 }
 0x10f   :  { %v2534_v37 = vunpack.i.l.bf16 %v3876_v60  ;;  %v2535_v55 = vunpack.i.h.bf16 %v3876_v60  ;;  %v2499_v60 = vunpack.i.l.bf16 %v3867_v51 }
 0x111   :  { %v1181_v28 = vsel %vm123_vm4, %v1180_v10, %v2534_v37  ;;  %v1431_v48 = vsel %vm123_vm4, %v1430_v59, %v2535_v55  ;;  %v2350_v59 = vpack.c.bf16 %v3899_v3, %v3899_v3 }
 0x112   :  { %v3882_v2 = vpop.permute.xlu0 %2552  ;;  %v1182_v19 = vsel %vm125_vm5, %v1181_v28, %v2484_v25  ;;  %v4177_v25 = vld [vmem:[#allocation19_spill] sm:$0xff] }
 0x113   :  { %v2555_v0 = vunpack.i.h.bf16 %v3882_v2  ;;  %v2554_v35 = vunpack.i.l.bf16 %v3882_v2 }
 0x115   :  { %v233_v49 = vsel %vm115_vm0, %v4177_v25, %v2555_v0  ;;  %v2154_v39 = vsel %vm115_vm0, %v4178_v52, %v2554_v35 }
 0x116   :  { %v3889_v20 = vpop.permute.xlu1 %2512  ;;  %v3894_v5 = vpop.permute.xlu0 %2557  ;;  %v234_v14 = vsel %vm117_vm1, %v233_v49, %v2500_v16 }
 0x117   :  { %v2559_v45 = vunpack.i.l.bf16 %v3894_v5 }
 0x11a   :  { %v2538_v17 = vpop.permute.xlu1 %2537  ;;  %v3913_v6 = vpop.permute.xlu0 %2567 }
 0x11b   :  { %v2540_v43 = vunpack.i.h.bf16 %v2538_v17  ;;  %v2539_v44 = vunpack.i.l.bf16 %v2538_v17  ;;  %v2504_v17 = vunpack.i.l.bf16 %v3872_v38  ;;  %v2560_v38 = vunpack.i.h.bf16 %v3894_v5 }
 0x11c   :  { %v2569_v16 = vunpack.i.l.bf16 %v3913_v6 }
 0x11d   :  { %v1793_v54 = vsel %vm119_vm2, %v1792_v33, %v2539_v44  ;;  %v2024_v23 = vsel %vm119_vm2, %v2023_v50, %v2540_v43 }
 0x11e   :  { %v2543_v8 = vpop.permute.xlu1 %2542  ;;  %v3930_v29 = vpop.permute.xlu0 %2572  ;;  %v1794_v51 = vsel %vm121_vm3, %v1793_v54, %v2489_v30  ;;  %v2025_v58 = vsel %vm121_vm3, %v2024_v23, %v2490_v36  ;;  %v1432_v30 = vsel %vm125_vm5, %v1431_v48, %v2485_v1 }
 0x11f   :  { %v2544_v61 = vunpack.i.l.bf16 %v2543_v8  ;;  %v2545_v37 = vunpack.i.h.bf16 %v2543_v8  ;;  %v2155_v8 = vsel %vm117_vm1, %v2154_v39, %v2499_v60  ;;  %v2575_v23 = vunpack.i.h.bf16 %v3930_v29 }
 0x121   :  { %v1183_v62 = vsel %vm127_vm6, %v1182_v19, %v2544_v61  ;;  %v1433_v15 = vsel %vm127_vm6, %v1432_v30, %v2545_v37 }
 0x122   :  { %v2548_v9 = vpop.permute.xlu1 %2547  ;;  %v2344_v13 = vpack.c.bf16 %v1183_v62, %v1183_v62  ;;  %v3944_v56 = vpop.permute.xlu0 %2577  ;;  %v2346_v53 = vpack.c.bf16 %v1433_v15, %v1433_v15  ;;  %v2574_v62 = vunpack.i.l.bf16 %v3930_v29 }
 0x123   :  { %v2550_v2 = vunpack.i.h.bf16 %v2548_v9  ;;  %v2549_v63 = vunpack.i.l.bf16 %v2548_v9  ;;  %v2580_v3 = vunpack.i.h.bf16 %v3944_v56  ;;  %v2579_v25 = vunpack.i.l.bf16 %v3944_v56 }
 0x124   :  { %1188 = vrot.lane.b32.xlu1 %v2344_v13, %s2734_s0 }
 0x125   :  { %v1795_v41 = vsel %vm123_vm4, %v1794_v51, %v2549_v63  ;;  %v2026_v46 = vsel %vm123_vm4, %v2025_v58, %v2550_v2  ;;  %v477_v56 = vsel %vm121_vm3, %v3779_v18, %v2579_v25 }
 0x126   :  { %v2563_v10 = vpop.permute.xlu1 %2562  ;;  %v1796_v57 = vsel %vm125_vm5, %v1795_v41, %v2494_v42  ;;  %v2027_v36 = vsel %vm125_vm5, %v2026_v46, %v2495_v11  ;;  %v3961_v31 = vpop.permute.xlu0 %2592  ;;  %v2510_v11 = vunpack.i.h.bf16 %v3880_v24  ;;  %v2570_v42 = vunpack.i.h.bf16 %v3913_v6 }
 0x127   :  { %v2565_v28 = vunpack.i.h.bf16 %v2563_v10  ;;  %v2564_v43 = vunpack.i.l.bf16 %v2563_v10  ;;  %v1797_v44 = vsel %vm127_vm6, %v1796_v57, %v2559_v45  ;;  %v2028_v1 = vsel %vm127_vm6, %v2027_v36, %v2560_v38 }
 0x128   :  { %1671 = vrot.lane.b32.xlu1 %v2348_v21, %s2734_s0  ;;  %v2349_v5 = vpack.c.bf16 %v1797_v44, %v1797_v44  ;;  %v2509_v21 = vunpack.i.l.bf16 %v3880_v24  ;;  %v2351_v54 = vpack.c.bf16 %v2028_v1, %v2028_v1  ;;  %v2595_v51 = vunpack.i.h.bf16 %v3961_v31 }
 0x129   :  { %v235_v32 = vsel %vm119_vm2, %v234_v14, %v2565_v28  ;;  %v2156_v55 = vsel %vm119_vm2, %v2155_v8, %v2564_v43  ;;  %v2594_v58 = vunpack.i.l.bf16 %v3961_v31  ;;  %v122_v46 = vsel %vm121_vm3, %v3776_v47, %v2580_v3 }
 0x12a   :  { %v236_v61 = vsel %vm121_vm3, %v235_v32, %v2505_v4  ;;  %v2157_v0 = vsel %vm121_vm3, %v2156_v55, %v2504_v17  ;;  %v3979_v33 = vpop.permute.xlu1 %2582  ;;  %v3983_v19 = vpop.permute.xlu0 %2602  ;;  %v1802_v35 = vrot.slane %v2349_v5, 6  ;;  %v2033_v48 = vrot.slane %v2351_v54, 6 }
 0x12b   :  { %v237_v50 = vsel %vm123_vm4, %v236_v61, %v2570_v42  ;;  %v2158_v6 = vsel %vm123_vm4, %v2157_v0, %v2569_v16  ;;  %v2584_v52 = vunpack.i.l.bf16 %v3979_v33  ;;  %v124_v30 = vsel %vm123_vm4, %v122_v46, %v2595_v51 }
 0x12c   :  { %1438 = vrot.lane.b32.xlu1 %v2346_v53, %s2734_s0  ;;  %1803 = vrot.lane.b32.xlu0 %v1802_v35, %s2734_s0  ;;  %v2159_v60 = vsel %vm125_vm5, %v2158_v6, %v2509_v21  ;;  %v238_v24 = vsel %vm125_vm5, %v237_v50, %v2510_v11  ;;  %v478_v36 = vsel %vm123_vm4, %v477_v56, %v2594_v58  ;;  %v2585_v31 = vunpack.i.h.bf16 %v3979_v33 }
 0x12d   :  { %v239_v9 = vsel %vm127_vm6, %v238_v24, %v2575_v23  ;;  %v2160_v37 = vsel %vm127_vm6, %v2159_v60, %v2574_v62  ;;  %v364_v47 = vsel %vm115_vm0, %v3579_v22, %v2584_v52  ;;  %v2514_v32 = vunpack.i.l.bf16 %v3889_v20 }
 0x12e   :  { %v3992_v4 = vpop.permute.xlu1 %2587  ;;  %v3997_v13 = vpop.permute.xlu0 %2612  ;;  %v2340_v2 = vpack.c.bf16 %v239_v9, %v239_v9  ;;  %v2352_v17 = vpack.c.bf16 %v2160_v37, %v2160_v37  ;;  %v714_v55 = vsel %vm115_vm0, %v3564_v27, %v2585_v31  ;;  %v2515_v61 = vunpack.i.h.bf16 %v3889_v20 }
 0x12f   :  { %v2589_v8 = vunpack.i.l.bf16 %v3992_v4  ;;  %v2615_v22 = vunpack.i.h.bf16 %v3997_v13  ;;  %v2590_v16 = vunpack.i.h.bf16 %v3992_v4  ;;  %v2604_v53 = vunpack.i.l.bf16 %v3983_v19 }
 0x130   :  { %1918 = vrot.lane.b32.xlu1 %v2350_v59, %s2734_s0  ;;  %2034 = vrot.lane.b32.xlu0 %v2033_v48, %s2734_s0  ;;  %v244_v29 = vrot.slane %v2340_v2, 6  ;;  %v2614_v21 = vunpack.i.l.bf16 %v3997_v13  ;;  %v365_v50 = vsel %vm117_vm1, %v364_v47, %v2514_v32  ;;  %v715_v54 = vsel %vm117_vm1, %v714_v55, %v2515_v61 }
 0x131   :  { %v366_v27 = vsel %vm119_vm2, %v365_v50, %v2589_v8  ;;  %v716_v6 = vsel %vm119_vm2, %v715_v54, %v2590_v16  ;;  %v2605_v4 = vunpack.i.h.bf16 %v3983_v19 }
 0x132   :  { %v2598_v63 = vpop.permute.xlu1 %2597  ;;  %v2623_v49 = vpop.permute.xlu0 %2622  ;;  %247 = vst.msk [vmem:[#allocation2] sm:$0xc] %vm246_vm7, %v244_v29  ;;  %v367_v13 = vsel %vm121_vm3, %v366_v27, %v2604_v53 }
 0x133   :  { %v2625_v39 = vunpack.i.h.bf16 %v2623_v49  ;;  %v2624_v45 = vunpack.i.l.bf16 %v2623_v49  ;;  %v2600_v28 = vunpack.i.h.bf16 %v2598_v63  ;;  %v2599_v5 = vunpack.i.l.bf16 %v2598_v63 }
 0x134   :  { %2165 = vrot.lane.b32.xlu1 %v2352_v17, %s2734_s0  ;;  %v717_v37 = vsel %vm121_vm3, %v716_v6, %v2605_v4 }
 0x135   :  { %v589_v0 = vsel %vm115_vm0, %v3573_v40, %v2600_v28  ;;  %v937_v20 = vsel %vm115_vm0, %v3576_v34, %v2599_v5 }
 0x136   :  { %v2608_v41 = vpop.permute.xlu1 %2607  ;;  %v2633_v38 = vpop.permute.xlu0 %2632  ;;  %v590_v62 = vsel %vm117_vm1, %v589_v0, %v2615_v22  ;;  %v938_v9 = vsel %vm117_vm1, %v937_v20, %v2614_v21 }
 0x137   :  { %v2610_v10 = vunpack.i.h.bf16 %v2608_v41  ;;  %v2609_v57 = vunpack.i.l.bf16 %v2608_v41  ;;  %v2635_v23 = vunpack.i.h.bf16 %v2633_v38  ;;  %v2634_v59 = vunpack.i.l.bf16 %v2633_v38 }
 0x139   :  { %v126_v43 = vsel %vm125_vm5, %v124_v30, %v2610_v10  ;;  %v479_v44 = vsel %vm125_vm5, %v478_v36, %v2609_v57  ;;  %v591_v34 = vsel %vm119_vm2, %v590_v62, %v2635_v23  ;;  %v939_v19 = vsel %vm119_vm2, %v938_v9, %v2634_v59 }
 0x13a   :  { %v2618_v15 = vpop.permute.xlu1 %2617  ;;  %v480_v18 = vsel %vm127_vm6, %v479_v44, %v2624_v45  ;;  %v128_v14 = vsel %vm127_vm6, %v126_v43, %v2625_v39  ;;  %v4024_v1 = vpop.permute.xlu0 %2642 }
 0x13b   :  { %v2341_v11 = vpack.c.bf16 %v480_v18, %v480_v18  ;;  %v129_v42 = vpack.c.bf16 %v128_v14, %v128_v14  ;;  %v2620_v60 = vunpack.i.h.bf16 %v2618_v15  ;;  %v2619_v24 = vunpack.i.l.bf16 %v2618_v15 }
 0x13c   :  { %v2644_v43 = vunpack.i.l.bf16 %v4024_v1  ;;  %v2645_v23 = vunpack.i.h.bf16 %v4024_v1 }
 0x13d   :  { %v485_v33 = vrot.slane %v2341_v11, 6  ;;  %131 = vst.msk [vmem:[#allocation2] sm:$0x3] %vm130_vm9, %v129_v42  ;;  %v368_v17 = vsel %vm123_vm4, %v367_v13, %v2619_v24  ;;  %v718_v3 = vsel %vm123_vm4, %v717_v37, %v2620_v60 }
 0x13e   :  { %v4038_v35 = vpop.permute.xlu1 %2627  ;;  %v2653_v40 = vpop.permute.xlu0 %2652 }
 0x13f   :  { %487 = vst.msk [vmem:[#allocation2 + $0x4] sm:$0xc] %vm246_vm7, %v485_v33  ;;  %v2655_v25 = vunpack.i.h.bf16 %v2653_v40  ;;  %v2654_v49 = vunpack.i.l.bf16 %v2653_v40  ;;  %v2629_v51 = vunpack.i.l.bf16 %v4038_v35  ;;  %v2630_v0 = vunpack.i.h.bf16 %v4038_v35 }
 0x141   :  { %v828_v18 = vsel %vm115_vm0, %v3658_v12, %v2629_v51  ;;  %v1067_v35 = vsel %vm115_vm0, %v3718_v26, %v2630_v0 }
 0x142   :  { %v2638_v48 = vpop.permute.xlu1 %2637  ;;  %v2663_v63 = vpop.permute.xlu0 %2662  ;;  %v829_v61 = vsel %vm117_vm1, %v828_v18, %v2644_v43  ;;  %v1068_v1 = vsel %vm117_vm1, %v1067_v35, %v2645_v23 }
 0x143   :  { %v2640_v2 = vunpack.i.h.bf16 %v2638_v48  ;;  %v2639_v29 = vunpack.i.l.bf16 %v2638_v48  ;;  %v2665_v45 = vunpack.i.h.bf16 %v2663_v63  ;;  %v2664_v41 = vunpack.i.l.bf16 %v2663_v63 }
 0x145   :  { %v369_v58 = vsel %vm125_vm5, %v368_v17, %v2639_v29  ;;  %v719_v52 = vsel %vm125_vm5, %v718_v3, %v2640_v2 }
 0x146   :  { %v2648_v39 = vpop.permute.xlu1 %2647  ;;  %v720_v46 = vsel %vm127_vm6, %v719_v52, %v2655_v25  ;;  %v370_v56 = vsel %vm127_vm6, %v369_v58, %v2654_v49  ;;  %v2673_v57 = vpop.permute.xlu0 %2672 }
 0x147   :  { %v2650_v38 = vunpack.i.h.bf16 %v2648_v39  ;;  %v2649_v10 = vunpack.i.l.bf16 %v2648_v39  ;;  %v2342_v30 = vpack.c.bf16 %v720_v46, %v720_v46  ;;  %v371_v36 = vpack.c.bf16 %v370_v56, %v370_v56 }
 0x148   :  { %v2675_v31 = vunpack.i.h.bf16 %v2673_v57  ;;  %v2674_v28 = vunpack.i.l.bf16 %v2673_v57 }
 0x149   :  { %v592_v44 = vsel %vm121_vm3, %v591_v34, %v2650_v38  ;;  %v940_v47 = vsel %vm121_vm3, %v939_v19, %v2649_v10  ;;  %v725_v15 = vrot.slane %v2342_v30, 6  ;;  %372 = vst.msk [vmem:[#allocation2 + $0x4] sm:$0x3] %vm130_vm9, %v371_v36 }
 0x14a   :  { %v593_v14 = vsel %vm123_vm4, %v592_v44, %v2665_v45  ;;  %v941_v8 = vsel %vm123_vm4, %v940_v47, %v2664_v41  ;;  %v2658_v5 = vpop.permute.xlu1 %2657  ;;  %v2683_v32 = vpop.permute.xlu0 %2682 }
 0x14b   :  { %v594_v11 = vsel %vm125_vm5, %v593_v14, %v2675_v31  ;;  %v942_v42 = vsel %vm125_vm5, %v941_v8, %v2674_v28  ;;  %727 = vst.msk [vmem:[#allocation2 + $0x8] sm:$0xc] %vm246_vm7, %v725_v15  ;;  %v2659_v55 = vunpack.i.l.bf16 %v2658_v5  ;;  %v2685_v22 = vunpack.i.h.bf16 %v2683_v32  ;;  %v2169_v28 = vld [vmem:[%s4121_s1] sm:$0xf] }
 0x14c   :  { %v2684_v16 = vunpack.i.l.bf16 %v2683_v32  ;;  %v2660_v6 = vunpack.i.h.bf16 %v2658_v5 }
 0x14d   :  { %v595_v53 = vsel %vm127_vm6, %v594_v11, %v2685_v22  ;;  %v830_v20 = vsel %vm119_vm2, %v829_v61, %v2659_v55 }
 0x14e   :  { %v2668_v12 = vpop.permute.xlu1 %2667  ;;  %v943_v33 = vsel %vm127_vm6, %v942_v42, %v2684_v16  ;;  %v2693_v50 = vpop.permute.xlu0 %2692  ;;  %v596_v27 = vpack.c.bf16 %v595_v53, %v595_v53  ;;  %v1069_v13 = vsel %vm119_vm2, %v1068_v1, %v2660_v6 }
 0x14f   :  { %v2669_v21 = vunpack.i.l.bf16 %v2668_v12  ;;  %v2343_v54 = vpack.c.bf16 %v943_v33, %v943_v33  ;;  %v2670_v60 = vunpack.i.h.bf16 %v2668_v12  ;;  %v2695_v17 = vunpack.i.h.bf16 %v2693_v50 }
 0x150   :  { %597 = vst.msk [vmem:[#allocation2 + $0x8] sm:$0x3] %vm130_vm9, %v596_v27  ;;  %v2694_v3 = vunpack.i.l.bf16 %v2693_v50 }
 0x151   :  { %v948_v40 = vrot.slane %v2343_v54, 6  ;;  %v831_v24 = vsel %vm121_vm3, %v830_v20, %v2669_v21  ;;  %v1070_v26 = vsel %vm121_vm3, %v1069_v13, %v2670_v60 }
 0x152   :  { %v2678_v62 = vpop.permute.xlu1 %2677  ;;  %v1307_v59 = vpop.permute.xlu0 %1306 }
 0x153   :  { %v2679_v4 = vunpack.i.l.bf16 %v2678_v62  ;;  %950 = vst.msk [vmem:[#allocation2 + $0xc] sm:$0xc] %vm246_vm7, %v948_v40  ;;  %v2680_v9 = vunpack.i.h.bf16 %v2678_v62 }
 0x154   :  { %1310 = vst.msk [vmem:[#allocation2] sm:$0xc] %vm1309_vm10, %v1307_v59 }
 0x155   :  { %v832_v48 = vsel %vm123_vm4, %v831_v24, %v2679_v4  ;;  %v1071_v63 = vsel %vm123_vm4, %v1070_v26, %v2680_v9 }
 0x156   :  { %v2688_v34 = vpop.permute.xlu1 %2687  ;;  %v1556_v29 = vpop.permute.xlu0 %1555 }
 0x157   :  { %v2690_v37 = vunpack.i.h.bf16 %v2688_v34  ;;  %v2689_v2 = vunpack.i.l.bf16 %v2688_v34  ;;  %1558 = vst.msk [vmem:[#allocation2 + $0x4] sm:$0xc] %vm1309_vm10, %v1556_v29 }
 0x159   :  { %v833_v25 = vsel %vm125_vm5, %v832_v48, %v2689_v2  ;;  %v1072_v49 = vsel %vm125_vm5, %v1071_v63, %v2690_v37 }
 0x15a   :  { %v834_v19 = vsel %vm127_vm6, %v833_v25, %v2694_v3  ;;  %v1073_v51 = vsel %vm127_vm6, %v1072_v49, %v2695_v17 }
 0x15b   :  { %v835_v58 = vpack.c.bf16 %v834_v19, %v834_v19  ;;  %v1074_v52 = vpack.c.bf16 %v1073_v51, %v1073_v51 }
 0x15d   :  { %836 = vst.msk [vmem:[#allocation2 + $0xc] sm:$0x3] %vm130_vm9, %v835_v58  ;;  %1075 = vst.msk [vmem:[#allocation2 + $0x10] sm:$0x3] %vm130_vm9, %v1074_v52 }
 0x196   :  { %v1189_v39 = vpop.permute.xlu1 %1188 }
 0x197   :  { %1192 = vst.msk [vmem:[#allocation2] sm:$0x3] %vm1191_vm11, %v1189_v39 }
 0x19a   :  { %v1672_v45 = vpop.permute.xlu1 %1671 }
 0x19b   :  { %1674 = vst.msk [vmem:[#allocation2 + $0x8] sm:$0x3] %vm1191_vm11, %v1672_v45 }
 0x19e   :  { %v1439_v41 = vpop.permute.xlu1 %1438  ;;  %v1804_v46 = vpop.permute.xlu0 %1803 }
 0x19f   :  { %1441 = vst.msk [vmem:[#allocation2 + $0x4] sm:$0x3] %vm1191_vm11, %v1439_v41 }
 0x1a0   :  { %1806 = vst.msk [vmem:[#allocation2 + $0x8] sm:$0xc] %vm1309_vm10, %v1804_v46 }
 0x1a2   :  { %v1919_v56 = vpop.permute.xlu1 %1918  ;;  %v2035_v38 = vpop.permute.xlu0 %2034 }
 0x1a3   :  { %1921 = vst.msk [vmem:[#allocation2 + $0xc] sm:$0x3] %vm1191_vm11, %v1919_v56 }
 0x1a4   :  { %2037 = vst.msk [vmem:[#allocation2 + $0xc] sm:$0xc] %vm1309_vm10, %v2035_v38 }
 0x1a6   :  { %v2166_v10 = vpop.permute.xlu1 %2165  ;;  %v2696_v57 = vld [vmem:[#allocation2] sm:$0xff]  }
 0x1a7   :  { %2168 = vst.msk [vmem:[#allocation2 + $0x10] sm:$0x3] %vm1191_vm11, %v2166_v10  ;;  %2358 = vmatpush3.bf16.msra.mxu0 %v2696_v57 }
 0x1a8   :  { %2359 = vmatprep.subr.bf16.mxu0 %v2724_v7 }
 0x1ab   :  { %v2697_v30 = vld [vmem:[#allocation2 + $0x8] sm:$0xff]  }
 0x1ac   :  { %2360 = vmatpush3.bf16.msra.mxu0 %v2697_v30 }
 0x1ad   :  { %2361 = vmatprep.subr.bf16.mxu0 %v2724_v7 }
 0x1ae   :  { %v2698_v36 = vld [vmem:[#allocation2 + $0x10] ss:$0 sps:$4 sm:$0x33]  }
 0x1af   :  { %v2196_v31 = vsel %vm2194_vm12, %v2698_v36, 0 }
 0x1b0   :  { %2362 = vmatpush3.bf16.msra.mxu0 %v2196_v31 }
 0x1b3   :  { %2364 = vmatmul.mubr.msk.bf16.vlgmr.msra.gmra.mrb[0].mxu0 %vm2190_vm13, %v2169_v28 }
 0x286   :  { %v2232_v43 = vpop.f32.mrb[0].mxu0 }
 0x287   :  { %2240 = vadd.xlane.f32.xlu0 %v2232_v43  ;;  %v2365_v44 = vpop.f32.mrb[1].mxu0  ;;  %v2244_v47 = vmul.f32 %v2232_v43, %v2232_v43  ;;  %v2238_v15 = vpack.c.bf16 %v2232_v43, %v2232_v43 }
 0x288   :  { %v2235_v18 = vpop.f32.mrb[2].mxu0 }
 0x289   :  { %2245 = vadd.xlane.f32.xlu1 %v2244_v47  ;;  %v2366_v14 = vpop.f32.mrb[3].mxu0  ;;  %2239 = vst [vmem:[#allocation3] sm:$0xf] %v2238_v15 }
 0x28a   :  { %2710 = shalt.err (!%p2707_p4)
}
 0x28b   :  { %s2711_s30 = scalar_lea.hbm %s4122_s2, 64 }
 0x28c   :  { %p2712_p5 = scmp.ne.s32.totalorder %s4122_s2, %s2711_s30  ;;  %p2715_p6 = scmp.lt.u32.totalorder %s2711_s30, %s4122_s2 }
 0x28e   :  { %p2717_p7 = pnand %p2715_p6, %p2712_p5 }
 0x290   :  { %2720 = shalt.err (!%p2717_p7)
}
 0x291   :  { %2258 = dma.vmem_to_hbm [thread:$0]  %s2256_s27, 64, %s4122_s2, [#allocation4]   ;;  %vm2242_vm14 = vcmask 7168   ;;  %vm2247_vm15 = vcmask 15368  }
 0x314   :  { %v2241_v7 = vpop.xlane.xlu0 %2240 }
 0x315   :  { %2243 = vst.msk [vmem:[%s4123_s3] sm:$0xff] %vm2242_vm14, %v2241_v7 }
 0x316   :  { %v2246_v8 = vpop.xlane.xlu1 %2245 }
 0x317   :  { %2248 = vst.msk [vmem:[%s4123_s3] sm:$0xff] %vm2247_vm15, %v2246_v8 }
 0x318   :  { %2721 = dma.done.wait [#allocation4], 64  }
 0x319   :  { %2722 = vsyncadd [#allocation4], 4294967232 }
 0x31a   :  { %2266 = vsyncpa [#allocation4], 1 }

</bundles_post_ra>
